<compile_context>
chip_gen: v6e
topology: v6e:2x2x1
jax: 0.10.0
libtpu: 0.0.40
codegen_flags: <defaults>
</compile_context>

<pallas_src>
import jax
import jax.numpy as jnp
import numpy as np
from jax.experimental import pallas as pl
from jax.experimental.pallas import tpu as pltpu

# ---- small shapes consistent with the module ----
B = 2      # batch
T = 8      # maxlen_out
S = 8      # maxlen_in (must equal T: src_attn reuses the (T, T) tgt_q_mask)
D = 32     # size (model dim)
H = 4      # attention heads
DK = D // H
FF = 64    # feed-forward hidden dim
EPS = 1e-12
NEG = -1e30                       # stands in for dtype-min used by masked_fill
SCALE = 1.0 / float(np.sqrt(DK))
BW = 3 * D                        # bias-pack row width (widest row = fused qkv bias)
PREC = jax.lax.Precision.HIGHEST  # used only by the fp32 reference


# ---------------- in-kernel math helpers ----------------
def _bf(x):
    return x.astype(jnp.bfloat16)


def _mm(a, w):
    """bf16 multiply, f32 accumulate on the MXU (2-D x 2-D)."""
    return jnp.dot(_bf(a), _bf(w), preferred_element_type=jnp.float32)


def _layernorm(x, g, b):
    # one-pass statistics: the two cross-lane reductions are independent
    mean = jnp.mean(x, axis=-1, keepdims=True)
    mean_sq = jnp.mean(x * x, axis=-1, keepdims=True)
    var = mean_sq - mean * mean
    return (x - mean) * jax.lax.rsqrt(var + EPS) * g + b


def _attend(q_arr, q_off, kv_arr, k_off, v_off, bias, keepf, tq, tk):
    """Multi-headed scaled-dot-product attention core.

    q_arr:  (B, tq, *) f32 holding the projected queries at column q_off.
    kv_arr: (B, tk, *) f32 holding the projected keys at k_off, values at v_off.
    bias:   (B, tq, tk) additive mask (0 keep / NEG masked), f32.
    keepf:  (B, tq, tk) {0,1} f32 — zeroes attention rows that are fully masked.
    Returns the lane-concatenated head contexts, (B*tq, D) f32.
    """
    ctx_heads = []
    for h in range(H):                       # static unroll; heads independent
        lo = h * DK
        qh = _bf(q_arr[:, :, q_off + lo:q_off + lo + DK])
        kh = _bf(kv_arr[:, :, k_off + lo:k_off + lo + DK])
        vh = _bf(kv_arr[:, :, v_off + lo:v_off + lo + DK])
        s = jnp.einsum('bqd,bkd->bqk', qh, kh,
                       preferred_element_type=jnp.float32) * SCALE + bias
        smax = jnp.max(s, axis=-1, keepdims=True)
        e = jnp.exp(s - smax)                             # f32
        a = e * pl.reciprocal(jnp.sum(e, axis=-1, keepdims=True), approx=True)
        a = a * keepf                        # reference zeroes attn after softmax
        ctx = jnp.einsum('bqk,bkd->bqd', _bf(a), vh,
                         preferred_element_type=jnp.float32)   # (B, tq, DK)
        ctx_heads.append(ctx.reshape(B * tq, DK))
    return jnp.concatenate(ctx_heads, axis=-1)            # (B*tq, D)


# ---------------- Pallas kernel: whole layer in one program ----------------
def il_decoder_layer_kernel(tgt_ref, mask_ref, mem_ref,
                            w_qkv_ref, w_kv_ref, w_dd_ref,
                            ff_w1_ref, ff_w2_ref, b_ref, ln_ref, out_ref):
    x2 = tgt_ref[...].reshape(B * T, D)      # leading-dim merge (T == 8 sublanes)
    mem2 = mem_ref[...].reshape(B * S, D)

    keep = mask_ref[...] > 0.0                              # (B, T, T) bool
    keepf = keep.astype(jnp.float32)
    bias = jnp.where(keep, 0.0, NEG)                        # additive mask, f32

    # --- self-attention: x = tgt + self_attn(norm1(tgt), ..., tgt_mask) ---
    y2 = _layernorm(x2, ln_ref[0], ln_ref[3])
    qkv = (_mm(y2, w_qkv_ref[...]) + b_ref[0, :]).reshape(B, T, 3 * D)  # 1 MXU call
    ctx = _attend(qkv, 0, qkv, D, 2 * D, bias, keepf, T, T)
    x2 = x2 + _mm(ctx, w_dd_ref[0]) + b_ref[1, :D]          # fused out-projection

    # --- source-attention: x = x + src_attn(norm2(x), memory, memory, tgt_q_mask) ---
    y2 = _layernorm(x2, ln_ref[1], ln_ref[4])
    q = (_mm(y2, w_dd_ref[1]) + b_ref[2, :D]).reshape(B, T, D)
    kv = (_mm(mem2, w_kv_ref[...]) + b_ref[3, :2 * D]).reshape(B, S, 2 * D)  # fused K/V
    ctx = _attend(q, 0, kv, 0, D, bias, keepf, T, S)
    x2 = x2 + _mm(ctx, w_dd_ref[2]) + b_ref[4, :D]

    # --- feed-forward: x = x + W2(relu(W1 norm3(x))) ---
    y2 = _layernorm(x2, ln_ref[2], ln_ref[5])
    hdn = jnp.maximum(_mm(y2, ff_w1_ref[...]) + b_ref[5, :FF], 0.0)
    x2 = x2 + _mm(hdn, ff_w2_ref[...]) + b_ref[6, :D]

    out_ref[...] = x2.reshape(B, T, D)
    # TODO(synk): dropout is identity (eval mode); cache / infer / concat_after
    # paths of the module are not modeled (config: cache=None, infer=False,
    # concat_after=False); memory_mask is unused by the module's forward.


# ---------------- wrapper: pack params, single pallas_call, grid=(1,) ----------------
def _pack_params(params):
    (ln_g, ln_b, sa_w, sa_b, sr_w, sr_b, ff_w1, ff_b1, ff_w2, ff_b2) = params
    # fused self-attn QKV and src-attn KV weights (bf16 -> half the DMA/VMEM)
    w_qkv = jnp.concatenate([sa_w[0], sa_w[1], sa_w[2]], axis=1).astype(jnp.bfloat16)
    w_kv = jnp.concatenate([sr_w[1], sr_w[2]], axis=1).astype(jnp.bfloat16)
    # the three remaining (D, D) matrices: [self_out, src_q, src_out]
    w_dd = jnp.stack([sa_w[3], sr_w[0], sr_w[3]]).astype(jnp.bfloat16)
    w_ff1 = ff_w1.astype(jnp.bfloat16)
    w_ff2 = ff_w2.astype(jnp.bfloat16)

    def row(v):
        v = jnp.reshape(v, (-1,)).astype(jnp.float32)
        return jnp.pad(v, (0, BW - v.shape[0]))

    # every bias on its own row -> all in-kernel slices are lane-0 aligned
    b_pack = jnp.stack([
        row(jnp.concatenate([sa_b[0], sa_b[1], sa_b[2]])),   # self qkv bias (96)
        row(sa_b[3]),                                        # self out      (32)
        row(sr_b[0]),                                        # src  q        (32)
        row(jnp.concatenate([sr_b[1], sr_b[2]])),            # src  kv       (64)
        row(sr_b[3]),                                        # src  out      (32)
        row(ff_b1),                                          # ff   b1       (64)
        row(ff_b2),                                          # ff   b2       (32)
    ])                                                       # (7, 96) f32
    ln_pack = jnp.concatenate([ln_g, ln_b], axis=0)          # (6, D) f32
    return w_qkv, w_kv, w_dd, w_ff1, w_ff2, b_pack, ln_pack


def il_decoder_layer(tgt, tgt_mask, memory, memory_mask, params):
    # src_attn reuses the (T, T) tgt_q_mask -> only well-defined when S == T
    # (this mirrors the module, whose masked_fill broadcast also requires it).
    assert memory.shape[1] == tgt.shape[1], "maxlen_in must equal maxlen_out"
    w_qkv, w_kv, w_dd, w_ff1, w_ff2, b_pack, ln_pack = _pack_params(params)

    def c(shape):
        zeros = (0,) * len(shape)
        return pl.BlockSpec(shape, lambda i, z=zeros: z)

    x = pl.pallas_call(
        il_decoder_layer_kernel,
        out_shape=jax.ShapeDtypeStruct((B, T, D), jnp.float32),
        grid_spec=pltpu.PrefetchScalarGridSpec(
            num_scalar_prefetch=0,
            grid=(1,),            # batch folded: one program on every generation
            in_specs=[
                c((B, T, D)),     # tgt
                c((B, T, T)),     # tgt_mask (1.0 keep / 0.0 masked)
                c((B, S, D)),     # memory
                c((D, 3 * D)),    # fused self-attn Wqkv (bf16)
                c((D, 2 * D)),    # fused src-attn  Wkv  (bf16)
                c((3, D, D)),     # [self_out, src_q, src_out] (bf16)
                c((D, FF)),       # ff W1 (bf16)
                c((FF, D)),       # ff W2 (bf16)
                c((7, BW)),       # packed biases (f32)
                c((6, D)),        # LayerNorm gammas / betas (f32)
            ],
            out_specs=c((B, T, D)),
        ),
    )(tgt, tgt_mask, memory, w_qkv, w_kv, w_dd, w_ff1, w_ff2, b_pack, ln_pack)
    # Module returns (x, tgt_mask, memory, memory_mask)
    return x, tgt_mask, memory, memory_mask


# ---------------- pure-JAX fp32 reference (module-faithful) for validation ----------------
def ref_forward(tgt, tgt_mask, memory, params):
    (ln_g, ln_b, sa_w, sa_b, sr_w, sr_b, ff_w1, ff_b1, ff_w2, ff_b2) = params

    def ln(x, g, b):
        m = x.mean(-1, keepdims=True)
        v = ((x - m) ** 2).mean(-1, keepdims=True)
        return (x - m) / jnp.sqrt(v + EPS) * g + b

    def mha(q_in, k_in, v_in, mask, w, bias):
        q = jnp.einsum('btd,de->bte', q_in, w[0], precision=PREC) + bias[0]
        k = jnp.einsum('btd,de->bte', k_in, w[1], precision=PREC) + bias[1]
        v = jnp.einsum('btd,de->bte', v_in, w[2], precision=PREC) + bias[2]
        qh = q.reshape(B, -1, H, DK).transpose(0, 2, 1, 3)
        kh = k.reshape(B, -1, H, DK).transpose(0, 2, 1, 3)
        vh = v.reshape(B, -1, H, DK).transpose(0, 2, 1, 3)
        scores = jnp.einsum('bhqd,bhkd->bhqk', qh, kh, precision=PREC) / np.sqrt(DK)
        keep = (mask > 0.0)[:, None, :, :]
        scores = jnp.where(keep, scores, NEG)
        attn = jax.nn.softmax(scores, axis=-1)
        attn = jnp.where(keep, attn, 0.0)
        ctx = jnp.einsum('bhqk,bhkd->bhqd', attn, vh, precision=PREC)
        ctx = ctx.transpose(0, 2, 1, 3).reshape(B, -1, D)
        return jnp.einsum('btd,de->bte', ctx, w[3], precision=PREC) + bias[3]

    x = tgt
    y = ln(x, ln_g[0], ln_b[0])
    x = x + mha(y, y, y, tgt_mask, sa_w, sa_b)
    y = ln(x, ln_g[1], ln_b[1])
    x = x + mha(y, memory, memory, tgt_mask, sr_w, sr_b)
    y = ln(x, ln_g[2], ln_b[2])
    h = jnp.maximum(jnp.einsum('btd,df->btf', y, ff_w1, precision=PREC) + ff_b1, 0.0)
    x = x + jnp.einsum('btf,fd->btd', h, ff_w2, precision=PREC) + ff_b2
    return x


if __name__ == "__main__":
    key = jax.random.PRNGKey(0)
    ks = jax.random.split(key, 12)
    scale = 0.1

    # deterministic parameter init (shapes from the module's sub-modules)
    ln_g = 1.0 + scale * jax.random.normal(ks[0], (3, D), jnp.float32)
    ln_b = scale * jax.random.normal(ks[1], (3, D), jnp.float32)
    sa_w = scale * jax.random.normal(ks[2], (4, D, D), jnp.float32)
    sa_b = scale * jax.random.normal(ks[3], (4, D), jnp.float32)
    sr_w = scale * jax.random.normal(ks[4], (4, D, D), jnp.float32)
    sr_b = scale * jax.random.normal(ks[5], (4, D), jnp.float32)
    ff_w1 = scale * jax.random.normal(ks[6], (D, FF), jnp.float32)
    ff_b1 = scale * jax.random.normal(ks[7], (1, FF), jnp.float32)
    ff_w2 = scale * jax.random.normal(ks[8], (FF, D), jnp.float32)
    ff_b2 = scale * jax.random.normal(ks[9], (1, D), jnp.float32)
    params = (ln_g, ln_b, sa_w, sa_b, sr_w, sr_b, ff_w1, ff_b1, ff_w2, ff_b2)

    # inputs
    tgt = jax.random.normal(ks[10], (B, T, D), jnp.float32)
    memory = jax.random.normal(ks[11], (B, S, D), jnp.float32)
    # causal target mask, as float (1.0 keep / 0.0 masked)
    tgt_mask = jnp.broadcast_to(jnp.tril(jnp.ones((T, T), jnp.float32)), (B, T, T))
    memory_mask = jnp.ones((B, 1, S), jnp.float32)  # returned untouched

    out, out_mask, out_mem, out_mem_mask = il_decoder_layer(
        tgt, tgt_mask, memory, memory_mask, params)
    jax.block_until_ready(out)

    ref = ref_forward(tgt, tgt_mask, memory, params)
    # bf16 MXU matmuls + approx-reciprocal softmax + one-pass LN variance vs.
    # the fp32 HIGHEST reference -> relaxed tolerance (documented).
    np.testing.assert_allclose(np.asarray(out), np.asarray(ref), rtol=2e-2, atol=2e-2)
    assert out.shape == (B, T, D)

    print("KERNEL_OK")
</pallas_src>

<mosaic_0001>
module attributes {stable_mosaic.version = 11 : i64} {
  func.func @il_decoder_layer_kernel(%arg0: i32, %arg1: memref<2x8x32xf32, #tpu.memory_space<vmem>>, %arg2: memref<2x8x8xf32, #tpu.memory_space<vmem>>, %arg3: memref<2x8x32xf32, #tpu.memory_space<vmem>>, %arg4: memref<32x96xbf16, #tpu.memory_space<vmem>>, %arg5: memref<32x64xbf16, #tpu.memory_space<vmem>>, %arg6: memref<3x32x32xbf16, #tpu.memory_space<vmem>>, %arg7: memref<32x64xbf16, #tpu.memory_space<vmem>>, %arg8: memref<64x32xbf16, #tpu.memory_space<vmem>>, %arg9: memref<7x96xf32, #tpu.memory_space<vmem>>, %arg10: memref<6x32xf32, #tpu.memory_space<vmem>>, %arg11: memref<2x8x32xf32, #tpu.memory_space<vmem>>) attributes {dimension_semantics = [#tpu.dimension_semantics<arbitrary>], iteration_bounds = array<i64: 1>, scalar_prefetch = 0 : i64, scratch_operands = 0 : i64, tpu.core_type = #tpu.core_type<tc>, window_params = [{pipeline_mode = #tpu.pipeline_mode<synchronous>, transform_indices = @transform_0, window_bounds = array<i64: 2, 8, 32>}, {pipeline_mode = #tpu.pipeline_mode<synchronous>, transform_indices = @transform_1, window_bounds = array<i64: 2, 8, 8>}, {pipeline_mode = #tpu.pipeline_mode<synchronous>, transform_indices = @transform_2, window_bounds = array<i64: 2, 8, 32>}, {pipeline_mode = #tpu.pipeline_mode<synchronous>, transform_indices = @transform_3, window_bounds = array<i64: 32, 96>}, {pipeline_mode = #tpu.pipeline_mode<synchronous>, transform_indices = @transform_4, window_bounds = array<i64: 32, 64>}, {pipeline_mode = #tpu.pipeline_mode<synchronous>, transform_indices = @transform_5, window_bounds = array<i64: 3, 32, 32>}, {pipeline_mode = #tpu.pipeline_mode<synchronous>, transform_indices = @transform_6, window_bounds = array<i64: 32, 64>}, {pipeline_mode = #tpu.pipeline_mode<synchronous>, transform_indices = @transform_7, window_bounds = array<i64: 64, 32>}, {pipeline_mode = #tpu.pipeline_mode<synchronous>, transform_indices = @transform_8, window_bounds = array<i64: 7, 96>}, {pipeline_mode = #tpu.pipeline_mode<synchronous>, transform_indices = @transform_9, window_bounds = array<i64: 6, 32>}, {pipeline_mode = #tpu.pipeline_mode<synchronous>, transform_indices = @transform_10, window_bounds = array<i64: 2, 8, 32>}]} {
    %c0 = arith.constant 0 : index
    %c0_0 = arith.constant 0 : index
    %c0_1 = arith.constant 0 : index
    %0 = vector.load %arg1[%c0, %c0_0, %c0_1] : memref<2x8x32xf32, #tpu.memory_space<vmem>>, vector<2x8x32xf32>
    %1 = vector.shape_cast %0 : vector<2x8x32xf32> to vector<16x32xf32>
    %c0_2 = arith.constant 0 : index
    %c0_3 = arith.constant 0 : index
    %c0_4 = arith.constant 0 : index
    %2 = vector.load %arg3[%c0_2, %c0_3, %c0_4] : memref<2x8x32xf32, #tpu.memory_space<vmem>>, vector<2x8x32xf32>
    %3 = vector.shape_cast %2 : vector<2x8x32xf32> to vector<16x32xf32>
    %c0_5 = arith.constant 0 : index
    %c0_6 = arith.constant 0 : index
    %c0_7 = arith.constant 0 : index
    %4 = vector.load %arg2[%c0_5, %c0_6, %c0_7] : memref<2x8x8xf32, #tpu.memory_space<vmem>>, vector<2x8x8xf32>
    %cst = arith.constant 0.000000e+00 : f32
    %5 = vector.broadcast %cst : f32 to vector<2x8x8xf32>
    %6 = arith.cmpf ogt, %4, %5 : vector<2x8x8xf32>
    %7 = arith.extui %6 : vector<2x8x8xi1> to vector<2x8x8xi32>
    %8 = arith.sitofp %7 : vector<2x8x8xi32> to vector<2x8x8xf32>
    %cst_8 = arith.constant 0.000000e+00 : f32
    %cst_9 = arith.constant -1.000000e+30 : f32
    %9 = vector.broadcast %cst_8 : f32 to vector<2x8x8xf32>
    %10 = vector.broadcast %cst_9 : f32 to vector<2x8x8xf32>
    %11 = arith.select %6, %9, %10 : vector<2x8x8xi1>, vector<2x8x8xf32>
    %c0_10 = arith.constant 0 : index
    %c0_11 = arith.constant 0 : index
    %12 = vector.load %arg10[%c0_10, %c0_11] : memref<6x32xf32, #tpu.memory_space<vmem>>, vector<1x32xf32>
    %13 = vector.shape_cast %12 : vector<1x32xf32> to vector<32xf32>
    %c3 = arith.constant 3 : index
    %c0_12 = arith.constant 0 : index
    %14 = vector.load %arg10[%c3, %c0_12] : memref<6x32xf32, #tpu.memory_space<vmem>>, vector<1x32xf32>
    %15 = vector.shape_cast %14 : vector<1x32xf32> to vector<32xf32>
    %cst_13 = arith.constant dense<0.000000e+00> : vector<16xf32>
    %16 = vector.multi_reduction <add>, %1, %cst_13 [1] : vector<16x32xf32> to vector<16xf32>
    %17 = vector.shape_cast %16 : vector<16xf32> to vector<16x1xf32>
    %cst_14 = arith.constant 3.200000e+01 : f32
    %18 = vector.broadcast %cst_14 : f32 to vector<16x1xf32>
    %19 = arith.divf %17, %18 : vector<16x1xf32>
    %20 = arith.mulf %1, %1 : vector<16x32xf32>
    %cst_15 = arith.constant dense<0.000000e+00> : vector<16xf32>
    %21 = vector.multi_reduction <add>, %20, %cst_15 [1] : vector<16x32xf32> to vector<16xf32>
    %22 = vector.shape_cast %21 : vector<16xf32> to vector<16x1xf32>
    %cst_16 = arith.constant 3.200000e+01 : f32
    %23 = vector.broadcast %cst_16 : f32 to vector<16x1xf32>
    %24 = arith.divf %22, %23 : vector<16x1xf32>
    %25 = arith.mulf %19, %19 : vector<16x1xf32>
    %26 = arith.subf %24, %25 : vector<16x1xf32>
    %27 = vector.broadcast %19 : vector<16x1xf32> to vector<16x32xf32>
    %28 = arith.subf %1, %27 : vector<16x32xf32>
    %cst_17 = arith.constant 9.99999996E-13 : f32
    %29 = vector.broadcast %cst_17 : f32 to vector<16x1xf32>
    %30 = arith.addf %26, %29 : vector<16x1xf32>
    %31 = math.rsqrt %30 : vector<16x1xf32>
    %32 = vector.broadcast %31 : vector<16x1xf32> to vector<16x32xf32>
    %33 = arith.mulf %28, %32 : vector<16x32xf32>
    %34 = vector.shape_cast %13 : vector<32xf32> to vector<1x32xf32>
    %35 = vector.broadcast %34 : vector<1x32xf32> to vector<16x32xf32>
    %36 = arith.mulf %33, %35 : vector<16x32xf32>
    %37 = vector.shape_cast %15 : vector<32xf32> to vector<1x32xf32>
    %38 = vector.broadcast %37 : vector<1x32xf32> to vector<16x32xf32>
    %39 = arith.addf %36, %38 : vector<16x32xf32>
    %c0_18 = arith.constant 0 : index
    %c0_19 = arith.constant 0 : index
    %40 = vector.load %arg4[%c0_18, %c0_19] : memref<32x96xbf16, #tpu.memory_space<vmem>>, vector<32x96xbf16>
    %41 = arith.truncf %39 : vector<16x32xf32> to vector<16x32xbf16>
    %cst_20 = arith.constant dense<0.000000e+00> : vector<16x96xf32>
    %42 = tpu.matmul %41, %40, %cst_20 {dimension_numbers = #tpu.dot_dimension_numbers<[1], [0], [0], [1], [0, 0, 1, 1], [], []>} : vector<16x32xbf16>, vector<32x96xbf16>, vector<16x96xf32> -> vector<16x96xf32>
    %c0_21 = arith.constant 0 : index
    %c0_22 = arith.constant 0 : index
    %43 = vector.load %arg9[%c0_21, %c0_22] : memref<7x96xf32, #tpu.memory_space<vmem>>, vector<1x96xf32>
    %44 = vector.shape_cast %43 : vector<1x96xf32> to vector<96xf32>
    %45 = vector.shape_cast %44 : vector<96xf32> to vector<1x96xf32>
    %46 = vector.broadcast %45 : vector<1x96xf32> to vector<16x96xf32>
    %47 = arith.addf %42, %46 : vector<16x96xf32>
    %48 = vector.shape_cast %47 : vector<16x96xf32> to vector<2x8x96xf32>
    %49 = vector.extract_strided_slice %48 {offsets = [0, 0, 0], sizes = [2, 8, 8], strides = [1, 1, 1]} : vector<2x8x96xf32> to vector<2x8x8xf32>
    %50 = arith.truncf %49 : vector<2x8x8xf32> to vector<2x8x8xbf16>
    %51 = vector.extract_strided_slice %48 {offsets = [0, 0, 32], sizes = [2, 8, 8], strides = [1, 1, 1]} : vector<2x8x96xf32> to vector<2x8x8xf32>
    %52 = arith.truncf %51 : vector<2x8x8xf32> to vector<2x8x8xbf16>
    %53 = vector.extract_strided_slice %48 {offsets = [0, 0, 64], sizes = [2, 8, 8], strides = [1, 1, 1]} : vector<2x8x96xf32> to vector<2x8x8xf32>
    %54 = arith.truncf %53 : vector<2x8x8xf32> to vector<2x8x8xbf16>
    "tpu.trace_start"() <{level = 10 : i32, message = "bqd,bkd->bqk"}> : () -> ()
    %cst_23 = arith.constant dense<0.000000e+00> : vector<2x8x8xf32>
    %55 = tpu.matmul %50, %52, %cst_23 {dimension_numbers = #tpu.dot_dimension_numbers<[2], [2], [1], [1], [0, 0, 0, 1, 1, 1], [0], [0]>} : vector<2x8x8xbf16>, vector<2x8x8xbf16>, vector<2x8x8xf32> -> vector<2x8x8xf32>
    "tpu.trace_stop"() : () -> ()
    %cst_24 = arith.constant 0.353553385 : f32
    %56 = vector.broadcast %cst_24 : f32 to vector<2x8x8xf32>
    %57 = arith.mulf %55, %56 : vector<2x8x8xf32>
    %58 = arith.addf %57, %11 : vector<2x8x8xf32>
    %cst_25 = arith.constant dense<0xFF800000> : vector<2x8xf32>
    %59 = vector.multi_reduction <maximumf>, %58, %cst_25 [2] : vector<2x8x8xf32> to vector<2x8xf32>
    %60 = vector.shape_cast %59 : vector<2x8xf32> to vector<2x8x1xf32>
    %61 = vector.broadcast %60 : vector<2x8x1xf32> to vector<2x8x8xf32>
    %62 = arith.subf %58, %61 : vector<2x8x8xf32>
    %63 = math.exp %62 : vector<2x8x8xf32>
    %cst_26 = arith.constant dense<0.000000e+00> : vector<2x8xf32>
    %64 = vector.multi_reduction <add>, %63, %cst_26 [2] : vector<2x8x8xf32> to vector<2x8xf32>
    %65 = vector.shape_cast %64 : vector<2x8xf32> to vector<2x8x1xf32>
    %66 = tpu.reciprocal %65 {approx = true} : vector<2x8x1xf32> -> vector<2x8x1xf32>
    %67 = vector.broadcast %66 : vector<2x8x1xf32> to vector<2x8x8xf32>
    %68 = arith.mulf %63, %67 : vector<2x8x8xf32>
    %69 = arith.mulf %68, %8 : vector<2x8x8xf32>
    %70 = arith.truncf %69 : vector<2x8x8xf32> to vector<2x8x8xbf16>
    "tpu.trace_start"() <{level = 10 : i32, message = "bqk,bkd->bqd"}> : () -> ()
    %cst_27 = arith.constant dense<0.000000e+00> : vector<2x8x8xf32>
    %71 = tpu.matmul %70, %54, %cst_27 {dimension_numbers = #tpu.dot_dimension_numbers<[2], [1], [1], [2], [0, 0, 0, 1, 1, 2], [0], [0]>} : vector<2x8x8xbf16>, vector<2x8x8xbf16>, vector<2x8x8xf32> -> vector<2x8x8xf32>
    "tpu.trace_stop"() : () -> ()
    %72 = vector.shape_cast %71 : vector<2x8x8xf32> to vector<16x8xf32>
    %73 = vector.extract_strided_slice %48 {offsets = [0, 0, 8], sizes = [2, 8, 8], strides = [1, 1, 1]} : vector<2x8x96xf32> to vector<2x8x8xf32>
    %74 = arith.truncf %73 : vector<2x8x8xf32> to vector<2x8x8xbf16>
    %75 = vector.extract_strided_slice %48 {offsets = [0, 0, 40], sizes = [2, 8, 8], strides = [1, 1, 1]} : vector<2x8x96xf32> to vector<2x8x8xf32>
    %76 = arith.truncf %75 : vector<2x8x8xf32> to vector<2x8x8xbf16>
    %77 = vector.extract_strided_slice %48 {offsets = [0, 0, 72], sizes = [2, 8, 8], strides = [1, 1, 1]} : vector<2x8x96xf32> to vector<2x8x8xf32>
    %78 = arith.truncf %77 : vector<2x8x8xf32> to vector<2x8x8xbf16>
    "tpu.trace_start"() <{level = 10 : i32, message = "bqd,bkd->bqk"}> : () -> ()
    %cst_28 = arith.constant dense<0.000000e+00> : vector<2x8x8xf32>
    %79 = tpu.matmul %74, %76, %cst_28 {dimension_numbers = #tpu.dot_dimension_numbers<[2], [2], [1], [1], [0, 0, 0, 1, 1, 1], [0], [0]>} : vector<2x8x8xbf16>, vector<2x8x8xbf16>, vector<2x8x8xf32> -> vector<2x8x8xf32>
    "tpu.trace_stop"() : () -> ()
    %cst_29 = arith.constant 0.353553385 : f32
    %80 = vector.broadcast %cst_29 : f32 to vector<2x8x8xf32>
    %81 = arith.mulf %79, %80 : vector<2x8x8xf32>
    %82 = arith.addf %81, %11 : vector<2x8x8xf32>
    %cst_30 = arith.constant dense<0xFF800000> : vector<2x8xf32>
    %83 = vector.multi_reduction <maximumf>, %82, %cst_30 [2] : vector<2x8x8xf32> to vector<2x8xf32>
    %84 = vector.shape_cast %83 : vector<2x8xf32> to vector<2x8x1xf32>
    %85 = vector.broadcast %84 : vector<2x8x1xf32> to vector<2x8x8xf32>
    %86 = arith.subf %82, %85 : vector<2x8x8xf32>
    %87 = math.exp %86 : vector<2x8x8xf32>
    %cst_31 = arith.constant dense<0.000000e+00> : vector<2x8xf32>
    %88 = vector.multi_reduction <add>, %87, %cst_31 [2] : vector<2x8x8xf32> to vector<2x8xf32>
    %89 = vector.shape_cast %88 : vector<2x8xf32> to vector<2x8x1xf32>
    %90 = tpu.reciprocal %89 {approx = true} : vector<2x8x1xf32> -> vector<2x8x1xf32>
    %91 = vector.broadcast %90 : vector<2x8x1xf32> to vector<2x8x8xf32>
    %92 = arith.mulf %87, %91 : vector<2x8x8xf32>
    %93 = arith.mulf %92, %8 : vector<2x8x8xf32>
    %94 = arith.truncf %93 : vector<2x8x8xf32> to vector<2x8x8xbf16>
    "tpu.trace_start"() <{level = 10 : i32, message = "bqk,bkd->bqd"}> : () -> ()
    %cst_32 = arith.constant dense<0.000000e+00> : vector<2x8x8xf32>
    %95 = tpu.matmul %94, %78, %cst_32 {dimension_numbers = #tpu.dot_dimension_numbers<[2], [1], [1], [2], [0, 0, 0, 1, 1, 2], [0], [0]>} : vector<2x8x8xbf16>, vector<2x8x8xbf16>, vector<2x8x8xf32> -> vector<2x8x8xf32>
    "tpu.trace_stop"() : () -> ()
    %96 = vector.shape_cast %95 : vector<2x8x8xf32> to vector<16x8xf32>
    %97 = vector.extract_strided_slice %48 {offsets = [0, 0, 16], sizes = [2, 8, 8], strides = [1, 1, 1]} : vector<2x8x96xf32> to vector<2x8x8xf32>
    %98 = arith.truncf %97 : vector<2x8x8xf32> to vector<2x8x8xbf16>
    %99 = vector.extract_strided_slice %48 {offsets = [0, 0, 48], sizes = [2, 8, 8], strides = [1, 1, 1]} : vector<2x8x96xf32> to vector<2x8x8xf32>
    %100 = arith.truncf %99 : vector<2x8x8xf32> to vector<2x8x8xbf16>
    %101 = vector.extract_strided_slice %48 {offsets = [0, 0, 80], sizes = [2, 8, 8], strides = [1, 1, 1]} : vector<2x8x96xf32> to vector<2x8x8xf32>
    %102 = arith.truncf %101 : vector<2x8x8xf32> to vector<2x8x8xbf16>
    "tpu.trace_start"() <{level = 10 : i32, message = "bqd,bkd->bqk"}> : () -> ()
    %cst_33 = arith.constant dense<0.000000e+00> : vector<2x8x8xf32>
    %103 = tpu.matmul %98, %100, %cst_33 {dimension_numbers = #tpu.dot_dimension_numbers<[2], [2], [1], [1], [0, 0, 0, 1, 1, 1], [0], [0]>} : vector<2x8x8xbf16>, vector<2x8x8xbf16>, vector<2x8x8xf32> -> vector<2x8x8xf32>
    "tpu.trace_stop"() : () -> ()
    %cst_34 = arith.constant 0.353553385 : f32
    %104 = vector.broadcast %cst_34 : f32 to vector<2x8x8xf32>
    %105 = arith.mulf %103, %104 : vector<2x8x8xf32>
    %106 = arith.addf %105, %11 : vector<2x8x8xf32>
    %cst_35 = arith.constant dense<0xFF800000> : vector<2x8xf32>
    %107 = vector.multi_reduction <maximumf>, %106, %cst_35 [2] : vector<2x8x8xf32> to vector<2x8xf32>
    %108 = vector.shape_cast %107 : vector<2x8xf32> to vector<2x8x1xf32>
    %109 = vector.broadcast %108 : vector<2x8x1xf32> to vector<2x8x8xf32>
    %110 = arith.subf %106, %109 : vector<2x8x8xf32>
    %111 = math.exp %110 : vector<2x8x8xf32>
    %cst_36 = arith.constant dense<0.000000e+00> : vector<2x8xf32>
    %112 = vector.multi_reduction <add>, %111, %cst_36 [2] : vector<2x8x8xf32> to vector<2x8xf32>
    %113 = vector.shape_cast %112 : vector<2x8xf32> to vector<2x8x1xf32>
    %114 = tpu.reciprocal %113 {approx = true} : vector<2x8x1xf32> -> vector<2x8x1xf32>
    %115 = vector.broadcast %114 : vector<2x8x1xf32> to vector<2x8x8xf32>
    %116 = arith.mulf %111, %115 : vector<2x8x8xf32>
    %117 = arith.mulf %116, %8 : vector<2x8x8xf32>
    %118 = arith.truncf %117 : vector<2x8x8xf32> to vector<2x8x8xbf16>
    "tpu.trace_start"() <{level = 10 : i32, message = "bqk,bkd->bqd"}> : () -> ()
    %cst_37 = arith.constant dense<0.000000e+00> : vector<2x8x8xf32>
    %119 = tpu.matmul %118, %102, %cst_37 {dimension_numbers = #tpu.dot_dimension_numbers<[2], [1], [1], [2], [0, 0, 0, 1, 1, 2], [0], [0]>} : vector<2x8x8xbf16>, vector<2x8x8xbf16>, vector<2x8x8xf32> -> vector<2x8x8xf32>
    "tpu.trace_stop"() : () -> ()
    %120 = vector.shape_cast %119 : vector<2x8x8xf32> to vector<16x8xf32>
    %121 = vector.extract_strided_slice %48 {offsets = [0, 0, 24], sizes = [2, 8, 8], strides = [1, 1, 1]} : vector<2x8x96xf32> to vector<2x8x8xf32>
    %122 = arith.truncf %121 : vector<2x8x8xf32> to vector<2x8x8xbf16>
    %123 = vector.extract_strided_slice %48 {offsets = [0, 0, 56], sizes = [2, 8, 8], strides = [1, 1, 1]} : vector<2x8x96xf32> to vector<2x8x8xf32>
    %124 = arith.truncf %123 : vector<2x8x8xf32> to vector<2x8x8xbf16>
    %125 = vector.extract_strided_slice %48 {offsets = [0, 0, 88], sizes = [2, 8, 8], strides = [1, 1, 1]} : vector<2x8x96xf32> to vector<2x8x8xf32>
    %126 = arith.truncf %125 : vector<2x8x8xf32> to vector<2x8x8xbf16>
    "tpu.trace_start"() <{level = 10 : i32, message = "bqd,bkd->bqk"}> : () -> ()
    %cst_38 = arith.constant dense<0.000000e+00> : vector<2x8x8xf32>
    %127 = tpu.matmul %122, %124, %cst_38 {dimension_numbers = #tpu.dot_dimension_numbers<[2], [2], [1], [1], [0, 0, 0, 1, 1, 1], [0], [0]>} : vector<2x8x8xbf16>, vector<2x8x8xbf16>, vector<2x8x8xf32> -> vector<2x8x8xf32>
    "tpu.trace_stop"() : () -> ()
    %cst_39 = arith.constant 0.353553385 : f32
    %128 = vector.broadcast %cst_39 : f32 to vector<2x8x8xf32>
    %129 = arith.mulf %127, %128 : vector<2x8x8xf32>
    %130 = arith.addf %129, %11 : vector<2x8x8xf32>
    %cst_40 = arith.constant dense<0xFF800000> : vector<2x8xf32>
    %131 = vector.multi_reduction <maximumf>, %130, %cst_40 [2] : vector<2x8x8xf32> to vector<2x8xf32>
    %132 = vector.shape_cast %131 : vector<2x8xf32> to vector<2x8x1xf32>
    %133 = vector.broadcast %132 : vector<2x8x1xf32> to vector<2x8x8xf32>
    %134 = arith.subf %130, %133 : vector<2x8x8xf32>
    %135 = math.exp %134 : vector<2x8x8xf32>
    %cst_41 = arith.constant dense<0.000000e+00> : vector<2x8xf32>
    %136 = vector.multi_reduction <add>, %135, %cst_41 [2] : vector<2x8x8xf32> to vector<2x8xf32>
    %137 = vector.shape_cast %136 : vector<2x8xf32> to vector<2x8x1xf32>
    %138 = tpu.reciprocal %137 {approx = true} : vector<2x8x1xf32> -> vector<2x8x1xf32>
    %139 = vector.broadcast %138 : vector<2x8x1xf32> to vector<2x8x8xf32>
    %140 = arith.mulf %135, %139 : vector<2x8x8xf32>
    %141 = arith.mulf %140, %8 : vector<2x8x8xf32>
    %142 = arith.truncf %141 : vector<2x8x8xf32> to vector<2x8x8xbf16>
    "tpu.trace_start"() <{level = 10 : i32, message = "bqk,bkd->bqd"}> : () -> ()
    %cst_42 = arith.constant dense<0.000000e+00> : vector<2x8x8xf32>
    %143 = tpu.matmul %142, %126, %cst_42 {dimension_numbers = #tpu.dot_dimension_numbers<[2], [1], [1], [2], [0, 0, 0, 1, 1, 2], [0], [0]>} : vector<2x8x8xbf16>, vector<2x8x8xbf16>, vector<2x8x8xf32> -> vector<2x8x8xf32>
    "tpu.trace_stop"() : () -> ()
    %144 = vector.shape_cast %143 : vector<2x8x8xf32> to vector<16x8xf32>
    %145 = tpu.concatenate %72, %96, %120, %144 in 1 : vector<16x8xf32>, vector<16x8xf32>, vector<16x8xf32>, vector<16x8xf32> -> vector<16x32xf32>
    %c0_43 = arith.constant 0 : index
    %c0_44 = arith.constant 0 : index
    %c0_45 = arith.constant 0 : index
    %146 = vector.load %arg6[%c0_43, %c0_44, %c0_45] : memref<3x32x32xbf16, #tpu.memory_space<vmem>>, vector<1x32x32xbf16>
    %147 = vector.shape_cast %146 : vector<1x32x32xbf16> to vector<32x32xbf16>
    %148 = arith.truncf %145 : vector<16x32xf32> to vector<16x32xbf16>
    %cst_46 = arith.constant dense<0.000000e+00> : vector<16x32xf32>
    %149 = tpu.matmul %148, %147, %cst_46 {dimension_numbers = #tpu.dot_dimension_numbers<[1], [0], [0], [1], [0, 0, 1, 1], [], []>} : vector<16x32xbf16>, vector<32x32xbf16>, vector<16x32xf32> -> vector<16x32xf32>
    %150 = arith.addf %1, %149 : vector<16x32xf32>
    %c1 = arith.constant 1 : index
    %c0_47 = arith.constant 0 : index
    %151 = vector.load %arg9[%c1, %c0_47] : memref<7x96xf32, #tpu.memory_space<vmem>>, vector<1x32xf32>
    %152 = vector.shape_cast %151 : vector<1x32xf32> to vector<32xf32>
    %153 = vector.shape_cast %152 : vector<32xf32> to vector<1x32xf32>
    %154 = vector.broadcast %153 : vector<1x32xf32> to vector<16x32xf32>
    %155 = arith.addf %150, %154 : vector<16x32xf32>
    %c1_48 = arith.constant 1 : index
    %c0_49 = arith.constant 0 : index
    %156 = vector.load %arg10[%c1_48, %c0_49] : memref<6x32xf32, #tpu.memory_space<vmem>>, vector<1x32xf32>
    %157 = vector.shape_cast %156 : vector<1x32xf32> to vector<32xf32>
    %c4 = arith.constant 4 : index
    %c0_50 = arith.constant 0 : index
    %158 = vector.load %arg10[%c4, %c0_50] : memref<6x32xf32, #tpu.memory_space<vmem>>, vector<1x32xf32>
    %159 = vector.shape_cast %158 : vector<1x32xf32> to vector<32xf32>
    %cst_51 = arith.constant dense<0.000000e+00> : vector<16xf32>
    %160 = vector.multi_reduction <add>, %155, %cst_51 [1] : vector<16x32xf32> to vector<16xf32>
    %161 = vector.shape_cast %160 : vector<16xf32> to vector<16x1xf32>
    %cst_52 = arith.constant 3.200000e+01 : f32
    %162 = vector.broadcast %cst_52 : f32 to vector<16x1xf32>
    %163 = arith.divf %161, %162 : vector<16x1xf32>
    %164 = arith.mulf %155, %155 : vector<16x32xf32>
    %cst_53 = arith.constant dense<0.000000e+00> : vector<16xf32>
    %165 = vector.multi_reduction <add>, %164, %cst_53 [1] : vector<16x32xf32> to vector<16xf32>
    %166 = vector.shape_cast %165 : vector<16xf32> to vector<16x1xf32>
    %cst_54 = arith.constant 3.200000e+01 : f32
    %167 = vector.broadcast %cst_54 : f32 to vector<16x1xf32>
    %168 = arith.divf %166, %167 : vector<16x1xf32>
    %169 = arith.mulf %163, %163 : vector<16x1xf32>
    %170 = arith.subf %168, %169 : vector<16x1xf32>
    %171 = vector.broadcast %163 : vector<16x1xf32> to vector<16x32xf32>
    %172 = arith.subf %155, %171 : vector<16x32xf32>
    %cst_55 = arith.constant 9.99999996E-13 : f32
    %173 = vector.broadcast %cst_55 : f32 to vector<16x1xf32>
    %174 = arith.addf %170, %173 : vector<16x1xf32>
    %175 = math.rsqrt %174 : vector<16x1xf32>
    %176 = vector.broadcast %175 : vector<16x1xf32> to vector<16x32xf32>
    %177 = arith.mulf %172, %176 : vector<16x32xf32>
    %178 = vector.shape_cast %157 : vector<32xf32> to vector<1x32xf32>
    %179 = vector.broadcast %178 : vector<1x32xf32> to vector<16x32xf32>
    %180 = arith.mulf %177, %179 : vector<16x32xf32>
    %181 = vector.shape_cast %159 : vector<32xf32> to vector<1x32xf32>
    %182 = vector.broadcast %181 : vector<1x32xf32> to vector<16x32xf32>
    %183 = arith.addf %180, %182 : vector<16x32xf32>
    %c1_56 = arith.constant 1 : index
    %c0_57 = arith.constant 0 : index
    %c0_58 = arith.constant 0 : index
    %184 = vector.load %arg6[%c1_56, %c0_57, %c0_58] : memref<3x32x32xbf16, #tpu.memory_space<vmem>>, vector<1x32x32xbf16>
    %185 = vector.shape_cast %184 : vector<1x32x32xbf16> to vector<32x32xbf16>
    %186 = arith.truncf %183 : vector<16x32xf32> to vector<16x32xbf16>
    %cst_59 = arith.constant dense<0.000000e+00> : vector<16x32xf32>
    %187 = tpu.matmul %186, %185, %cst_59 {dimension_numbers = #tpu.dot_dimension_numbers<[1], [0], [0], [1], [0, 0, 1, 1], [], []>} : vector<16x32xbf16>, vector<32x32xbf16>, vector<16x32xf32> -> vector<16x32xf32>
    %c2 = arith.constant 2 : index
    %c0_60 = arith.constant 0 : index
    %188 = vector.load %arg9[%c2, %c0_60] : memref<7x96xf32, #tpu.memory_space<vmem>>, vector<1x32xf32>
    %189 = vector.shape_cast %188 : vector<1x32xf32> to vector<32xf32>
    %190 = vector.shape_cast %189 : vector<32xf32> to vector<1x32xf32>
    %191 = vector.broadcast %190 : vector<1x32xf32> to vector<16x32xf32>
    %192 = arith.addf %187, %191 : vector<16x32xf32>
    %193 = vector.shape_cast %192 : vector<16x32xf32> to vector<2x8x32xf32>
    %c0_61 = arith.constant 0 : index
    %c0_62 = arith.constant 0 : index
    %194 = vector.load %arg5[%c0_61, %c0_62] : memref<32x64xbf16, #tpu.memory_space<vmem>>, vector<32x64xbf16>
    %195 = arith.truncf %3 : vector<16x32xf32> to vector<16x32xbf16>
    %cst_63 = arith.constant dense<0.000000e+00> : vector<16x64xf32>
    %196 = tpu.matmul %195, %194, %cst_63 {dimension_numbers = #tpu.dot_dimension_numbers<[1], [0], [0], [1], [0, 0, 1, 1], [], []>} : vector<16x32xbf16>, vector<32x64xbf16>, vector<16x64xf32> -> vector<16x64xf32>
    %c3_64 = arith.constant 3 : index
    %c0_65 = arith.constant 0 : index
    %197 = vector.load %arg9[%c3_64, %c0_65] : memref<7x96xf32, #tpu.memory_space<vmem>>, vector<1x64xf32>
    %198 = vector.shape_cast %197 : vector<1x64xf32> to vector<64xf32>
    %199 = vector.shape_cast %198 : vector<64xf32> to vector<1x64xf32>
    %200 = vector.broadcast %199 : vector<1x64xf32> to vector<16x64xf32>
    %201 = arith.addf %196, %200 : vector<16x64xf32>
    %202 = vector.shape_cast %201 : vector<16x64xf32> to vector<2x8x64xf32>
    %203 = vector.extract_strided_slice %193 {offsets = [0, 0, 0], sizes = [2, 8, 8], strides = [1, 1, 1]} : vector<2x8x32xf32> to vector<2x8x8xf32>
    %204 = arith.truncf %203 : vector<2x8x8xf32> to vector<2x8x8xbf16>
    %205 = vector.extract_strided_slice %202 {offsets = [0, 0, 0], sizes = [2, 8, 8], strides = [1, 1, 1]} : vector<2x8x64xf32> to vector<2x8x8xf32>
    %206 = arith.truncf %205 : vector<2x8x8xf32> to vector<2x8x8xbf16>
    %207 = vector.extract_strided_slice %202 {offsets = [0, 0, 32], sizes = [2, 8, 8], strides = [1, 1, 1]} : vector<2x8x64xf32> to vector<2x8x8xf32>
    %208 = arith.truncf %207 : vector<2x8x8xf32> to vector<2x8x8xbf16>
    "tpu.trace_start"() <{level = 10 : i32, message = "bqd,bkd->bqk"}> : () -> ()
    %cst_66 = arith.constant dense<0.000000e+00> : vector<2x8x8xf32>
    %209 = tpu.matmul %204, %206, %cst_66 {dimension_numbers = #tpu.dot_dimension_numbers<[2], [2], [1], [1], [0, 0, 0, 1, 1, 1], [0], [0]>} : vector<2x8x8xbf16>, vector<2x8x8xbf16>, vector<2x8x8xf32> -> vector<2x8x8xf32>
    "tpu.trace_stop"() : () -> ()
    %cst_67 = arith.constant 0.353553385 : f32
    %210 = vector.broadcast %cst_67 : f32 to vector<2x8x8xf32>
    %211 = arith.mulf %209, %210 : vector<2x8x8xf32>
    %212 = arith.addf %211, %11 : vector<2x8x8xf32>
    %cst_68 = arith.constant dense<0xFF800000> : vector<2x8xf32>
    %213 = vector.multi_reduction <maximumf>, %212, %cst_68 [2] : vector<2x8x8xf32> to vector<2x8xf32>
    %214 = vector.shape_cast %213 : vector<2x8xf32> to vector<2x8x1xf32>
    %215 = vector.broadcast %214 : vector<2x8x1xf32> to vector<2x8x8xf32>
    %216 = arith.subf %212, %215 : vector<2x8x8xf32>
    %217 = math.exp %216 : vector<2x8x8xf32>
    %cst_69 = arith.constant dense<0.000000e+00> : vector<2x8xf32>
    %218 = vector.multi_reduction <add>, %217, %cst_69 [2] : vector<2x8x8xf32> to vector<2x8xf32>
    %219 = vector.shape_cast %218 : vector<2x8xf32> to vector<2x8x1xf32>
    %220 = tpu.reciprocal %219 {approx = true} : vector<2x8x1xf32> -> vector<2x8x1xf32>
    %221 = vector.broadcast %220 : vector<2x8x1xf32> to vector<2x8x8xf32>
    %222 = arith.mulf %217, %221 : vector<2x8x8xf32>
    %223 = arith.mulf %222, %8 : vector<2x8x8xf32>
    %224 = arith.truncf %223 : vector<2x8x8xf32> to vector<2x8x8xbf16>
    "tpu.trace_start"() <{level = 10 : i32, message = "bqk,bkd->bqd"}> : () -> ()
    %cst_70 = arith.constant dense<0.000000e+00> : vector<2x8x8xf32>
    %225 = tpu.matmul %224, %208, %cst_70 {dimension_numbers = #tpu.dot_dimension_numbers<[2], [1], [1], [2], [0, 0, 0, 1, 1, 2], [0], [0]>} : vector<2x8x8xbf16>, vector<2x8x8xbf16>, vector<2x8x8xf32> -> vector<2x8x8xf32>
    "tpu.trace_stop"() : () -> ()
    %226 = vector.shape_cast %225 : vector<2x8x8xf32> to vector<16x8xf32>
    %227 = vector.extract_strided_slice %193 {offsets = [0, 0, 8], sizes = [2, 8, 8], strides = [1, 1, 1]} : vector<2x8x32xf32> to vector<2x8x8xf32>
    %228 = arith.truncf %227 : vector<2x8x8xf32> to vector<2x8x8xbf16>
    %229 = vector.extract_strided_slice %202 {offsets = [0, 0, 8], sizes = [2, 8, 8], strides = [1, 1, 1]} : vector<2x8x64xf32> to vector<2x8x8xf32>
    %230 = arith.truncf %229 : vector<2x8x8xf32> to vector<2x8x8xbf16>
    %231 = vector.extract_strided_slice %202 {offsets = [0, 0, 40], sizes = [2, 8, 8], strides = [1, 1, 1]} : vector<2x8x64xf32> to vector<2x8x8xf32>
    %232 = arith.truncf %231 : vector<2x8x8xf32> to vector<2x8x8xbf16>
    "tpu.trace_start"() <{level = 10 : i32, message = "bqd,bkd->bqk"}> : () -> ()
    %cst_71 = arith.constant dense<0.000000e+00> : vector<2x8x8xf32>
    %233 = tpu.matmul %228, %230, %cst_71 {dimension_numbers = #tpu.dot_dimension_numbers<[2], [2], [1], [1], [0, 0, 0, 1, 1, 1], [0], [0]>} : vector<2x8x8xbf16>, vector<2x8x8xbf16>, vector<2x8x8xf32> -> vector<2x8x8xf32>
    "tpu.trace_stop"() : () -> ()
    %cst_72 = arith.constant 0.353553385 : f32
    %234 = vector.broadcast %cst_72 : f32 to vector<2x8x8xf32>
    %235 = arith.mulf %233, %234 : vector<2x8x8xf32>
    %236 = arith.addf %235, %11 : vector<2x8x8xf32>
    %cst_73 = arith.constant dense<0xFF800000> : vector<2x8xf32>
    %237 = vector.multi_reduction <maximumf>, %236, %cst_73 [2] : vector<2x8x8xf32> to vector<2x8xf32>
    %238 = vector.shape_cast %237 : vector<2x8xf32> to vector<2x8x1xf32>
    %239 = vector.broadcast %238 : vector<2x8x1xf32> to vector<2x8x8xf32>
    %240 = arith.subf %236, %239 : vector<2x8x8xf32>
    %241 = math.exp %240 : vector<2x8x8xf32>
    %cst_74 = arith.constant dense<0.000000e+00> : vector<2x8xf32>
    %242 = vector.multi_reduction <add>, %241, %cst_74 [2] : vector<2x8x8xf32> to vector<2x8xf32>
    %243 = vector.shape_cast %242 : vector<2x8xf32> to vector<2x8x1xf32>
    %244 = tpu.reciprocal %243 {approx = true} : vector<2x8x1xf32> -> vector<2x8x1xf32>
    %245 = vector.broadcast %244 : vector<2x8x1xf32> to vector<2x8x8xf32>
    %246 = arith.mulf %241, %245 : vector<2x8x8xf32>
    %247 = arith.mulf %246, %8 : vector<2x8x8xf32>
    %248 = arith.truncf %247 : vector<2x8x8xf32> to vector<2x8x8xbf16>
    "tpu.trace_start"() <{level = 10 : i32, message = "bqk,bkd->bqd"}> : () -> ()
    %cst_75 = arith.constant dense<0.000000e+00> : vector<2x8x8xf32>
    %249 = tpu.matmul %248, %232, %cst_75 {dimension_numbers = #tpu.dot_dimension_numbers<[2], [1], [1], [2], [0, 0, 0, 1, 1, 2], [0], [0]>} : vector<2x8x8xbf16>, vector<2x8x8xbf16>, vector<2x8x8xf32> -> vector<2x8x8xf32>
    "tpu.trace_stop"() : () -> ()
    %250 = vector.shape_cast %249 : vector<2x8x8xf32> to vector<16x8xf32>
    %251 = vector.extract_strided_slice %193 {offsets = [0, 0, 16], sizes = [2, 8, 8], strides = [1, 1, 1]} : vector<2x8x32xf32> to vector<2x8x8xf32>
    %252 = arith.truncf %251 : vector<2x8x8xf32> to vector<2x8x8xbf16>
    %253 = vector.extract_strided_slice %202 {offsets = [0, 0, 16], sizes = [2, 8, 8], strides = [1, 1, 1]} : vector<2x8x64xf32> to vector<2x8x8xf32>
    %254 = arith.truncf %253 : vector<2x8x8xf32> to vector<2x8x8xbf16>
    %255 = vector.extract_strided_slice %202 {offsets = [0, 0, 48], sizes = [2, 8, 8], strides = [1, 1, 1]} : vector<2x8x64xf32> to vector<2x8x8xf32>
    %256 = arith.truncf %255 : vector<2x8x8xf32> to vector<2x8x8xbf16>
    "tpu.trace_start"() <{level = 10 : i32, message = "bqd,bkd->bqk"}> : () -> ()
    %cst_76 = arith.constant dense<0.000000e+00> : vector<2x8x8xf32>
    %257 = tpu.matmul %252, %254, %cst_76 {dimension_numbers = #tpu.dot_dimension_numbers<[2], [2], [1], [1], [0, 0, 0, 1, 1, 1], [0], [0]>} : vector<2x8x8xbf16>, vector<2x8x8xbf16>, vector<2x8x8xf32> -> vector<2x8x8xf32>
    "tpu.trace_stop"() : () -> ()
    %cst_77 = arith.constant 0.353553385 : f32
    %258 = vector.broadcast %cst_77 : f32 to vector<2x8x8xf32>
    %259 = arith.mulf %257, %258 : vector<2x8x8xf32>
    %260 = arith.addf %259, %11 : vector<2x8x8xf32>
    %cst_78 = arith.constant dense<0xFF800000> : vector<2x8xf32>
    %261 = vector.multi_reduction <maximumf>, %260, %cst_78 [2] : vector<2x8x8xf32> to vector<2x8xf32>
    %262 = vector.shape_cast %261 : vector<2x8xf32> to vector<2x8x1xf32>
    %263 = vector.broadcast %262 : vector<2x8x1xf32> to vector<2x8x8xf32>
    %264 = arith.subf %260, %263 : vector<2x8x8xf32>
    %265 = math.exp %264 : vector<2x8x8xf32>
    %cst_79 = arith.constant dense<0.000000e+00> : vector<2x8xf32>
    %266 = vector.multi_reduction <add>, %265, %cst_79 [2] : vector<2x8x8xf32> to vector<2x8xf32>
    %267 = vector.shape_cast %266 : vector<2x8xf32> to vector<2x8x1xf32>
    %268 = tpu.reciprocal %267 {approx = true} : vector<2x8x1xf32> -> vector<2x8x1xf32>
    %269 = vector.broadcast %268 : vector<2x8x1xf32> to vector<2x8x8xf32>
    %270 = arith.mulf %265, %269 : vector<2x8x8xf32>
    %271 = arith.mulf %270, %8 : vector<2x8x8xf32>
    %272 = arith.truncf %271 : vector<2x8x8xf32> to vector<2x8x8xbf16>
    "tpu.trace_start"() <{level = 10 : i32, message = "bqk,bkd->bqd"}> : () -> ()
    %cst_80 = arith.constant dense<0.000000e+00> : vector<2x8x8xf32>
    %273 = tpu.matmul %272, %256, %cst_80 {dimension_numbers = #tpu.dot_dimension_numbers<[2], [1], [1], [2], [0, 0, 0, 1, 1, 2], [0], [0]>} : vector<2x8x8xbf16>, vector<2x8x8xbf16>, vector<2x8x8xf32> -> vector<2x8x8xf32>
    "tpu.trace_stop"() : () -> ()
    %274 = vector.shape_cast %273 : vector<2x8x8xf32> to vector<16x8xf32>
    %275 = vector.extract_strided_slice %193 {offsets = [0, 0, 24], sizes = [2, 8, 8], strides = [1, 1, 1]} : vector<2x8x32xf32> to vector<2x8x8xf32>
    %276 = arith.truncf %275 : vector<2x8x8xf32> to vector<2x8x8xbf16>
    %277 = vector.extract_strided_slice %202 {offsets = [0, 0, 24], sizes = [2, 8, 8], strides = [1, 1, 1]} : vector<2x8x64xf32> to vector<2x8x8xf32>
    %278 = arith.truncf %277 : vector<2x8x8xf32> to vector<2x8x8xbf16>
    %279 = vector.extract_strided_slice %202 {offsets = [0, 0, 56], sizes = [2, 8, 8], strides = [1, 1, 1]} : vector<2x8x64xf32> to vector<2x8x8xf32>
    %280 = arith.truncf %279 : vector<2x8x8xf32> to vector<2x8x8xbf16>
    "tpu.trace_start"() <{level = 10 : i32, message = "bqd,bkd->bqk"}> : () -> ()
    %cst_81 = arith.constant dense<0.000000e+00> : vector<2x8x8xf32>
    %281 = tpu.matmul %276, %278, %cst_81 {dimension_numbers = #tpu.dot_dimension_numbers<[2], [2], [1], [1], [0, 0, 0, 1, 1, 1], [0], [0]>} : vector<2x8x8xbf16>, vector<2x8x8xbf16>, vector<2x8x8xf32> -> vector<2x8x8xf32>
    "tpu.trace_stop"() : () -> ()
    %cst_82 = arith.constant 0.353553385 : f32
    %282 = vector.broadcast %cst_82 : f32 to vector<2x8x8xf32>
    %283 = arith.mulf %281, %282 : vector<2x8x8xf32>
    %284 = arith.addf %283, %11 : vector<2x8x8xf32>
    %cst_83 = arith.constant dense<0xFF800000> : vector<2x8xf32>
    %285 = vector.multi_reduction <maximumf>, %284, %cst_83 [2] : vector<2x8x8xf32> to vector<2x8xf32>
    %286 = vector.shape_cast %285 : vector<2x8xf32> to vector<2x8x1xf32>
    %287 = vector.broadcast %286 : vector<2x8x1xf32> to vector<2x8x8xf32>
    %288 = arith.subf %284, %287 : vector<2x8x8xf32>
    %289 = math.exp %288 : vector<2x8x8xf32>
    %cst_84 = arith.constant dense<0.000000e+00> : vector<2x8xf32>
    %290 = vector.multi_reduction <add>, %289, %cst_84 [2] : vector<2x8x8xf32> to vector<2x8xf32>
    %291 = vector.shape_cast %290 : vector<2x8xf32> to vector<2x8x1xf32>
    %292 = tpu.reciprocal %291 {approx = true} : vector<2x8x1xf32> -> vector<2x8x1xf32>
    %293 = vector.broadcast %292 : vector<2x8x1xf32> to vector<2x8x8xf32>
    %294 = arith.mulf %289, %293 : vector<2x8x8xf32>
    %295 = arith.mulf %294, %8 : vector<2x8x8xf32>
    %296 = arith.truncf %295 : vector<2x8x8xf32> to vector<2x8x8xbf16>
    "tpu.trace_start"() <{level = 10 : i32, message = "bqk,bkd->bqd"}> : () -> ()
    %cst_85 = arith.constant dense<0.000000e+00> : vector<2x8x8xf32>
    %297 = tpu.matmul %296, %280, %cst_85 {dimension_numbers = #tpu.dot_dimension_numbers<[2], [1], [1], [2], [0, 0, 0, 1, 1, 2], [0], [0]>} : vector<2x8x8xbf16>, vector<2x8x8xbf16>, vector<2x8x8xf32> -> vector<2x8x8xf32>
    "tpu.trace_stop"() : () -> ()
    %298 = vector.shape_cast %297 : vector<2x8x8xf32> to vector<16x8xf32>
    %299 = tpu.concatenate %226, %250, %274, %298 in 1 : vector<16x8xf32>, vector<16x8xf32>, vector<16x8xf32>, vector<16x8xf32> -> vector<16x32xf32>
    %c2_86 = arith.constant 2 : index
    %c0_87 = arith.constant 0 : index
    %c0_88 = arith.constant 0 : index
    %300 = vector.load %arg6[%c2_86, %c0_87, %c0_88] : memref<3x32x32xbf16, #tpu.memory_space<vmem>>, vector<1x32x32xbf16>
    %301 = vector.shape_cast %300 : vector<1x32x32xbf16> to vector<32x32xbf16>
    %302 = arith.truncf %299 : vector<16x32xf32> to vector<16x32xbf16>
    %cst_89 = arith.constant dense<0.000000e+00> : vector<16x32xf32>
    %303 = tpu.matmul %302, %301, %cst_89 {dimension_numbers = #tpu.dot_dimension_numbers<[1], [0], [0], [1], [0, 0, 1, 1], [], []>} : vector<16x32xbf16>, vector<32x32xbf16>, vector<16x32xf32> -> vector<16x32xf32>
    %304 = arith.addf %155, %303 : vector<16x32xf32>
    %c4_90 = arith.constant 4 : index
    %c0_91 = arith.constant 0 : index
    %305 = vector.load %arg9[%c4_90, %c0_91] : memref<7x96xf32, #tpu.memory_space<vmem>>, vector<1x32xf32>
    %306 = vector.shape_cast %305 : vector<1x32xf32> to vector<32xf32>
    %307 = vector.shape_cast %306 : vector<32xf32> to vector<1x32xf32>
    %308 = vector.broadcast %307 : vector<1x32xf32> to vector<16x32xf32>
    %309 = arith.addf %304, %308 : vector<16x32xf32>
    %c2_92 = arith.constant 2 : index
    %c0_93 = arith.constant 0 : index
    %310 = vector.load %arg10[%c2_92, %c0_93] : memref<6x32xf32, #tpu.memory_space<vmem>>, vector<1x32xf32>
    %311 = vector.shape_cast %310 : vector<1x32xf32> to vector<32xf32>
    %c5 = arith.constant 5 : index
    %c0_94 = arith.constant 0 : index
    %312 = vector.load %arg10[%c5, %c0_94] : memref<6x32xf32, #tpu.memory_space<vmem>>, vector<1x32xf32>
    %313 = vector.shape_cast %312 : vector<1x32xf32> to vector<32xf32>
    %cst_95 = arith.constant dense<0.000000e+00> : vector<16xf32>
    %314 = vector.multi_reduction <add>, %309, %cst_95 [1] : vector<16x32xf32> to vector<16xf32>
    %315 = vector.shape_cast %314 : vector<16xf32> to vector<16x1xf32>
    %cst_96 = arith.constant 3.200000e+01 : f32
    %316 = vector.broadcast %cst_96 : f32 to vector<16x1xf32>
    %317 = arith.divf %315, %316 : vector<16x1xf32>
    %318 = arith.mulf %309, %309 : vector<16x32xf32>
    %cst_97 = arith.constant dense<0.000000e+00> : vector<16xf32>
    %319 = vector.multi_reduction <add>, %318, %cst_97 [1] : vector<16x32xf32> to vector<16xf32>
    %320 = vector.shape_cast %319 : vector<16xf32> to vector<16x1xf32>
    %cst_98 = arith.constant 3.200000e+01 : f32
    %321 = vector.broadcast %cst_98 : f32 to vector<16x1xf32>
    %322 = arith.divf %320, %321 : vector<16x1xf32>
    %323 = arith.mulf %317, %317 : vector<16x1xf32>
    %324 = arith.subf %322, %323 : vector<16x1xf32>
    %325 = vector.broadcast %317 : vector<16x1xf32> to vector<16x32xf32>
    %326 = arith.subf %309, %325 : vector<16x32xf32>
    %cst_99 = arith.constant 9.99999996E-13 : f32
    %327 = vector.broadcast %cst_99 : f32 to vector<16x1xf32>
    %328 = arith.addf %324, %327 : vector<16x1xf32>
    %329 = math.rsqrt %328 : vector<16x1xf32>
    %330 = vector.broadcast %329 : vector<16x1xf32> to vector<16x32xf32>
    %331 = arith.mulf %326, %330 : vector<16x32xf32>
    %332 = vector.shape_cast %311 : vector<32xf32> to vector<1x32xf32>
    %333 = vector.broadcast %332 : vector<1x32xf32> to vector<16x32xf32>
    %334 = arith.mulf %331, %333 : vector<16x32xf32>
    %335 = vector.shape_cast %313 : vector<32xf32> to vector<1x32xf32>
    %336 = vector.broadcast %335 : vector<1x32xf32> to vector<16x32xf32>
    %337 = arith.addf %334, %336 : vector<16x32xf32>
    %c0_100 = arith.constant 0 : index
    %c0_101 = arith.constant 0 : index
    %338 = vector.load %arg7[%c0_100, %c0_101] : memref<32x64xbf16, #tpu.memory_space<vmem>>, vector<32x64xbf16>
    %339 = arith.truncf %337 : vector<16x32xf32> to vector<16x32xbf16>
    %cst_102 = arith.constant dense<0.000000e+00> : vector<16x64xf32>
    %340 = tpu.matmul %339, %338, %cst_102 {dimension_numbers = #tpu.dot_dimension_numbers<[1], [0], [0], [1], [0, 0, 1, 1], [], []>} : vector<16x32xbf16>, vector<32x64xbf16>, vector<16x64xf32> -> vector<16x64xf32>
    %c5_103 = arith.constant 5 : index
    %c0_104 = arith.constant 0 : index
    %341 = vector.load %arg9[%c5_103, %c0_104] : memref<7x96xf32, #tpu.memory_space<vmem>>, vector<1x64xf32>
    %342 = vector.shape_cast %341 : vector<1x64xf32> to vector<64xf32>
    %343 = vector.shape_cast %342 : vector<64xf32> to vector<1x64xf32>
    %344 = vector.broadcast %343 : vector<1x64xf32> to vector<16x64xf32>
    %345 = arith.addf %340, %344 : vector<16x64xf32>
    %cst_105 = arith.constant 0.000000e+00 : f32
    %346 = vector.broadcast %cst_105 : f32 to vector<16x64xf32>
    %347 = arith.maximumf %345, %346 : vector<16x64xf32>
    %c0_106 = arith.constant 0 : index
    %c0_107 = arith.constant 0 : index
    %348 = vector.load %arg8[%c0_106, %c0_107] : memref<64x32xbf16, #tpu.memory_space<vmem>>, vector<64x32xbf16>
    %349 = arith.truncf %347 : vector<16x64xf32> to vector<16x64xbf16>
    %cst_108 = arith.constant dense<0.000000e+00> : vector<16x32xf32>
    %350 = tpu.matmul %349, %348, %cst_108 {dimension_numbers = #tpu.dot_dimension_numbers<[1], [0], [0], [1], [0, 0, 1, 1], [], []>} : vector<16x64xbf16>, vector<64x32xbf16>, vector<16x32xf32> -> vector<16x32xf32>
    %351 = arith.addf %309, %350 : vector<16x32xf32>
    %c6 = arith.constant 6 : index
    %c0_109 = arith.constant 0 : index
    %352 = vector.load %arg9[%c6, %c0_109] : memref<7x96xf32, #tpu.memory_space<vmem>>, vector<1x32xf32>
    %353 = vector.shape_cast %352 : vector<1x32xf32> to vector<32xf32>
    %354 = vector.shape_cast %353 : vector<32xf32> to vector<1x32xf32>
    %355 = vector.broadcast %354 : vector<1x32xf32> to vector<16x32xf32>
    %356 = arith.addf %351, %355 : vector<16x32xf32>
    %357 = vector.shape_cast %356 : vector<16x32xf32> to vector<2x8x32xf32>
    %c0_110 = arith.constant 0 : index
    %c0_111 = arith.constant 0 : index
    %c0_112 = arith.constant 0 : index
    %358 = vector.load %arg11[%c0_110, %c0_111, %c0_112] : memref<2x8x32xf32, #tpu.memory_space<vmem>>, vector<2x8x32xf32>
    tpu.vector_store %arg11[%c0_110, %c0_111, %c0_112], %357 {strides = array<i32>} : memref<2x8x32xf32, #tpu.memory_space<vmem>>, vector<2x8x32xf32>,
    return
  }
  func.func @transform_0(%arg0: i32) -> (i32, i32, i32) {
    %c0_i32 = arith.constant 0 : i32
    %c0_i32_0 = arith.constant 0 : i32
    %c0_i32_1 = arith.constant 0 : i32
    %c0_i32_2 = arith.constant 0 : i32
    return %c0_i32, %c0_i32_0, %c0_i32_1 : i32, i32, i32
  }
  func.func @transform_1(%arg0: i32) -> (i32, i32, i32) {
    %c0_i32 = arith.constant 0 : i32
    %c0_i32_0 = arith.constant 0 : i32
    %c0_i32_1 = arith.constant 0 : i32
    %c0_i32_2 = arith.constant 0 : i32
    return %c0_i32, %c0_i32_0, %c0_i32_1 : i32, i32, i32
  }
  func.func @transform_2(%arg0: i32) -> (i32, i32, i32) {
    %c0_i32 = arith.constant 0 : i32
    %c0_i32_0 = arith.constant 0 : i32
    %c0_i32_1 = arith.constant 0 : i32
    %c0_i32_2 = arith.constant 0 : i32
    return %c0_i32, %c0_i32_0, %c0_i32_1 : i32, i32, i32
  }
  func.func @transform_3(%arg0: i32) -> (i32, i32) {
    %c0_i32 = arith.constant 0 : i32
    %c0_i32_0 = arith.constant 0 : i32
    %c0_i32_1 = arith.constant 0 : i32
    return %c0_i32, %c0_i32_0 : i32, i32
  }
  func.func @transform_4(%arg0: i32) -> (i32, i32) {
    %c0_i32 = arith.constant 0 : i32
    %c0_i32_0 = arith.constant 0 : i32
    %c0_i32_1 = arith.constant 0 : i32
    return %c0_i32, %c0_i32_0 : i32, i32
  }
  func.func @transform_5(%arg0: i32) -> (i32, i32, i32) {
    %c0_i32 = arith.constant 0 : i32
    %c0_i32_0 = arith.constant 0 : i32
    %c0_i32_1 = arith.constant 0 : i32
    %c0_i32_2 = arith.constant 0 : i32
    return %c0_i32, %c0_i32_0, %c0_i32_1 : i32, i32, i32
  }
  func.func @transform_6(%arg0: i32) -> (i32, i32) {
    %c0_i32 = arith.constant 0 : i32
    %c0_i32_0 = arith.constant 0 : i32
    %c0_i32_1 = arith.constant 0 : i32
    return %c0_i32, %c0_i32_0 : i32, i32
  }
  func.func @transform_7(%arg0: i32) -> (i32, i32) {
    %c0_i32 = arith.constant 0 : i32
    %c0_i32_0 = arith.constant 0 : i32
    %c0_i32_1 = arith.constant 0 : i32
    return %c0_i32, %c0_i32_0 : i32, i32
  }
  func.func @transform_8(%arg0: i32) -> (i32, i32) {
    %c0_i32 = arith.constant 0 : i32
    %c0_i32_0 = arith.constant 0 : i32
    %c0_i32_1 = arith.constant 0 : i32
    return %c0_i32, %c0_i32_0 : i32, i32
  }
  func.func @transform_9(%arg0: i32) -> (i32, i32) {
    %c0_i32 = arith.constant 0 : i32
    %c0_i32_0 = arith.constant 0 : i32
    %c0_i32_1 = arith.constant 0 : i32
    return %c0_i32, %c0_i32_0 : i32, i32
  }
  func.func @transform_10(%arg0: i32) -> (i32, i32, i32) {
    %c0_i32 = arith.constant 0 : i32
    %c0_i32_0 = arith.constant 0 : i32
    %c0_i32_1 = arith.constant 0 : i32
    %c0_i32_2 = arith.constant 0 : i32
    return %c0_i32, %c0_i32_0, %c0_i32_1 : i32, i32, i32
  }
}

</mosaic_0001>

<bundles_post_ra>
// kernel: tpu_custom_call.1
= control target key start
LH: loop header
LB: loop body
LE: loop exit
PB: predicated region body
PF: predicated region fallthrough
CT: control target
= control target key end

     0   :  { %15 = vsyncpa [#allocation3], 0  ;;  %s4042_s0 = inlined_call_operand.hbm [shape: f32[2,8,32], index: 0, kind: input, shape index: {}]   ;;  %s4043_s1 = inlined_call_operand.hbm [shape: f32[2,8,8], index: 1, kind: input, shape index: {}]   ;;  %s4044_s2 = inlined_call_operand.hbm [shape: f32[2,8,32], index: 2, kind: input, shape index: {}]   ;;  %s4045_s3 = inlined_call_operand.hbm [shape: bf16[32,96], index: 3, kind: input, shape index: {}]   ;;  %s4046_s4 = inlined_call_operand.hbm [shape: bf16[32,64], index: 4, kind: input, shape index: {}]   ;;  %s4047_s5 = inlined_call_operand.vmem [shape: bf16[3,32,32], index: 5, kind: input, shape index: {}]   ;;  %s4048_s6 = inlined_call_operand.hbm [shape: bf16[32,64], index: 6, kind: input, shape index: {}]   ;;  %s4049_s7 = inlined_call_operand.vmem [shape: bf16[64,32], index: 7, kind: input, shape index: {}]   ;;  %s4050_s8 = inlined_call_operand.vmem [shape: f32[7,96], index: 8, kind: input, shape index: {}]   ;;  %s4051_s9 = inlined_call_operand.vmem [shape: f32[6,32], index: 9, kind: input, shape index: {}]   ;;  %s4052_s10 = inlined_call_operand.hbm [shape: f32[2,8,32], index: 10, kind: output, shape index: {}]  }
   0x1   :  { %16 = vsyncpa [#allocation6], 0 }
   0x2   :  { %17 = vsyncpa [#allocation9], 0 }
   0x3   :  { %18 = vsyncpa [#allocation12], 0 }
   0x4   :  { %19 = vsyncpa [#allocation4], 0  ;;  %s3371_s13 = smov [#allocation5]   ;;  %s3372_s15 = smov [#allocation8]  }
   0x5   :  { %s37_s14 = sshll.u32 %s3371_s13, 4  ;;  %s61_s16 = sshll.u32 %s3372_s15, 4  ;;  %s38_s14 = int_to_ptr.vmem [resolvable:$true] %s37_s14  ;;  %s62_s16 = int_to_ptr.vmem [resolvable:$true] %s61_s16 }
   0x6   :  { %s3229_s17 = scalar_lea.vmem %s38_s14, 256  ;;  %p3234_p1 = scmp.lt.s32.totalorder %s38_s14, %s38_s14 }
   0x7   :  { %p3230_p0 = scmp.ne.s32.totalorder %s38_s14, %s3229_s17  ;;  %p3235_p2 = scmp.lt.s32.totalorder %s3229_s17, %s3229_s17 }
   0x9   :  { %p3236_p3 = por %p3235_p2, %p3234_p1 }
   0xb   :  { %p3237_p4 = pnand %p3236_p3, %p3230_p0 }
   0xd   :  { %3240 = shalt.err (!%p3237_p4)
}
   0xe   :  { %s3373_s18 = smov 128   ;;  %s3374_s19 = smov 8  }
   0xf   :  { %43 = dma.hbm_to_vmem [thread:$0]  %s4043_s1, 256, %s38_s14, [#allocation6], %s3373_s18, %s3373_s18, %s3374_s19  }
  0x10   :  { %s3249_s22 = scalar_lea.vmem %s62_s16, 256  ;;  %p3254_p6 = scmp.lt.s32.totalorder %s62_s16, %s62_s16 }
  0x11   :  { %p3250_p5 = scmp.ne.s32.totalorder %s62_s16, %s3249_s22  ;;  %p3255_p7 = scmp.lt.s32.totalorder %s3249_s22, %s3249_s22 }
  0x13   :  { %p3256_p8 = por %p3255_p7, %p3254_p6 }
  0x15   :  { %p3257_p9 = pnand %p3256_p8, %p3250_p5 }
  0x17   :  { %3260 = shalt.err (!%p3257_p9)
}
  0x18   :  { %s3375_s23 = smov 64   ;;  %s3376_s24 = smov 4  }
  0x19   :  { %67 = dma.hbm_to_vmem [thread:$0]  %s4045_s3, 256, %s62_s16, [#allocation9], %s3375_s23, %s3375_s23, %s3376_s24  }
  0x1a   :  { %s3377_s27 = smov [#allocation2]   ;;  %s3378_s29 = smov [#allocation7]  }
  0x1b   :  { %s25_s28 = sshll.u32 %s3377_s27, 4  ;;  %s49_s1 = sshll.u32 %s3378_s29, 4  ;;  %s26_s28 = int_to_ptr.vmem [resolvable:$true] %s25_s28  ;;  %s50_s1 = int_to_ptr.vmem [resolvable:$true] %s49_s1 }
  0x1c   :  { %s3269_s30 = scalar_lea.vmem %s26_s28, 256  ;;  %p3274_p11 = scmp.lt.s32.totalorder %s26_s28, %s26_s28 }
  0x1d   :  { %p3270_p10 = scmp.ne.s32.totalorder %s26_s28, %s3269_s30  ;;  %p3275_p12 = scmp.lt.s32.totalorder %s3269_s30, %s3269_s30 }
  0x1f   :  { %p3276_p13 = por %p3275_p12, %p3274_p11 }
  0x21   :  { %p3277_p0 = pnand %p3276_p13, %p3270_p10 }
  0x23   :  { %3280 = shalt.err (!%p3277_p0)
}
  0x24   :  { %31 = dma.hbm_to_vmem [thread:$0]  %s4042_s0, 256, %s26_s28, [#allocation3], %s3373_s18, %s3373_s18, %s3374_s19  }
  0x25   :  { %s3289_s3 = scalar_lea.vmem %s50_s1, 256  ;;  %p3294_p2 = scmp.lt.s32.totalorder %s50_s1, %s50_s1 }
  0x26   :  { %p3290_p1 = scmp.ne.s32.totalorder %s50_s1, %s3289_s3  ;;  %p3295_p3 = scmp.lt.s32.totalorder %s3289_s3, %s3289_s3 }
  0x28   :  { %p3296_p4 = por %p3295_p3, %p3294_p2 }
  0x2a   :  { %p3297_p5 = pnand %p3296_p4, %p3290_p1 }
  0x2c   :  { %3300 = shalt.err (!%p3297_p5)
}
  0x2d   :  { %55 = dma.hbm_to_vmem [thread:$0]  %s4044_s2, 256, %s50_s1, [#allocation6], %s3373_s18, %s3373_s18, %s3374_s19  }
  0x2e   :  { %s3379_s15 = smov [#allocation10]   ;;  %s3380_s17 = smov [#allocation11]  }
  0x2f   :  { %s73_s16 = sshll.u32 %s3379_s15, 4  ;;  %s87_s20 = sshll.u32 %s3380_s17, 4  ;;  %s74_s16 = int_to_ptr.vmem [resolvable:$true] %s73_s16  ;;  %s88_s20 = int_to_ptr.vmem [resolvable:$true] %s87_s20 }
  0x30   :  { %s3309_s0 = scalar_lea.vmem %s74_s16, 256  ;;  %p3314_p7 = scmp.lt.s32.totalorder %s74_s16, %s74_s16 }
  0x31   :  { %p3310_p6 = scmp.ne.s32.totalorder %s74_s16, %s3309_s0  ;;  %p3315_p8 = scmp.lt.s32.totalorder %s3309_s0, %s3309_s0 }
  0x33   :  { %p3316_p9 = por %p3315_p8, %p3314_p7 }
  0x35   :  { %p3317_p10 = pnand %p3316_p9, %p3310_p6 }
  0x37   :  { %3320 = shalt.err (!%p3317_p10)
}
  0x38   :  { %79 = dma.hbm_to_vmem [thread:$0]  %s4046_s4, 256, %s74_s16, [#allocation9], %s3375_s23, %s3375_s23, %s3376_s24  }
  0x39   :  { %s3329_s2 = scalar_lea.vmem %s88_s20, 256  ;;  %p3334_p12 = scmp.lt.s32.totalorder %s88_s20, %s88_s20 }
  0x3a   :  { %p3330_p11 = scmp.ne.s32.totalorder %s88_s20, %s3329_s2  ;;  %p3335_p13 = scmp.lt.s32.totalorder %s3329_s2, %s3329_s2 }
  0x3c   :  { %p3336_p0 = por %p3335_p13, %p3334_p12 }
  0x3e   :  { %p3337_p1 = pnand %p3336_p0, %p3330_p11 }
  0x40   :  { %3340 = shalt.err (!%p3337_p1)
}
  0x41   :  { %93 = dma.hbm_to_vmem [thread:$0]  %s4048_s6, 256, %s88_s20, [#allocation12], %s3375_s23, %s3375_s23, %s3376_s24  }
  0x42   :  { %3361 = dma.done.wait [#allocation3], 256  }
  0x43   :  { %3362 = vsyncadd [#allocation3], 4294967040 }
  0x44   :  { %3363 = dma.done.wait [#allocation6], 512  }
  0x45   :  { %3364 = vsyncadd [#allocation6], 4294966784 }
  0x46   :  { %3365 = dma.done.wait [#allocation9], 512  }
  0x47   :  { %3366 = vsyncadd [#allocation9], 4294966784 }
  0x48   :  { %3367 = dma.done.wait [#allocation12], 256  }
  0x49   :  { %3368 = vsyncadd [#allocation12], 4294967040  ;;  %vm135_vm0 = vcmask 261120   ;;  %v3488_v0 = vld [vmem:[#allocation2] sm:$0xff]  ;;  %v3490_v1 = vld [vmem:[#allocation2 + $0x8] sm:$0xff]  ;;  %v3381_v9 = vmov 0.0  }
  0x4a   :  { %v136_v2 = vsel %vm135_vm0, %v3488_v0, 0.0  ;;  %v145_v3 = vmul.f32 %v3488_v0, %v3488_v0  ;;  %v139_v4 = vsel %vm135_vm0, %v3490_v1, 0.0  ;;  %v146_v5 = vmul.f32 %v3490_v1, %v3490_v1  ;;  %v3129_v8 = vld [vmem:[#allocation8 + $0x8] sm:$0xff]   ;;  %2821 = vmatprep.subr.bf16.mxu1 %v3381_v9  ;;  %v3130_v10 = vld [vmem:[#allocation8] sm:$0xff]   ;;  %2835 = vmatprep.subr.bf16.mxu0 %v3381_v9  ;;  %v2658_v28 = vld [vmem:[%s4051_s9] ss:$0 sm:$0xff] }
  0x4b   :  { %137 = vadd.xlane.f32.xlu0 %v136_v2  ;;  %vm3382_vm1 = vmmov 0   ;;  %2822 = vmatpush3.bf16.msra.mxu1 %v3129_v8  ;;  %v2659_v33 = vld [vmem:[%s4051_s9 + $0x3] ss:$0 sm:$0xff]  ;;  %v2660_v38 = vld [vmem:[%s4050_s8] ss:$0 sm:$0xff]  ;;  %s3383_s1 = smov 96  }
  0x4c   :  { %v147_v6 = vsel %vm135_vm0, %v145_v3, 0.0  ;;  %v150_v7 = vsel %vm135_vm0, %v146_v5, 0.0  ;;  %2825 = vmatprep.mubr.msk.bf16.mxu1 %vm3382_vm1, %v3381_v9  ;;  %2823 = vmatprep.subr.bf16.mxu1 %v3381_v9  ;;  %vm250_vm2 = vcmask 64512   ;;  %v123_v51 = vld [vmem:[#allocation5] sm:$0xff]  ;;  %v3544_v52 = vld [vmem:[#allocation5 + $0x8] sm:$0xff]  ;;  %s3385_s30 = smov 88  }
  0x4d   :  { %148 = vadd.xlane.f32.xlu1 %v147_v6  ;;  %2837 = vmatprep.mubr.msk.bf16.mxu0 %vm3382_vm1, %v3381_v9  ;;  %vm125_vm3 = vcmp.gt.f32.partialorder %v123_v51, 0.0  ;;  %v3384_v54 = vmov -1e+30   ;;  %vm126_vm4 = vcmp.gt.f32.partialorder %v3544_v52, 0.0  ;;  %vm381_vm5 = vcmask 1043456   ;;  %s3386_s11 = smov 120  }
  0x4e   :  { %v3547_v55 = vsel %vm125_vm3, 0.0, %v3384_v54  ;;  %v3553_v61 = vsel %vm126_vm4, 0.0, %v3384_v54  ;;  %s3388_s12 = smov 80   ;;  %s3389_s3 = smov 112   ;;  %vm1177_vm6 = vcmask 130048   ;;  %vm1180_vm7 = vcmask 195584  }
  0x4f   :  { %140 = vadd.xlane.f32.xlu0 %v139_v4  ;;  %2824 = vmatpush3.bf16.msra.mxu1 %v3130_v10  ;;  %s3390_s13 = smov 48   ;;  %s3391_s14 = smov 72   ;;  %vm2580_vm8 = vcmask 523264  }
  0x50   :  { %2829 = vmatprep.subr.bf16.mxu1 %v3381_v9  ;;  %s3392_s15 = smov 104   ;;  %s3393_s16 = smov 40  }
  0x51   :  { %151 = vadd.xlane.f32.xlu1 %v150_v7  ;;  %s3394_s17 = smov 16   ;;  %s3395_s2 = smov 24  }
  0xd4   :  { %v138_v11 = vpop.xlane.xlu0 %137 }
  0xd5   :  { %v143_v12 = vmul.f32 0.03125, %v138_v11 }
  0xd6   :  { %v149_v13 = vpop.xlane.xlu1 %148 }
  0xd7   :  { %v155_v14 = vmul.f32 %v143_v12, %v143_v12  ;;  %v153_v15 = vmul.f32 0.03125, %v149_v13  ;;  %v159_v25 = vsub.f32 %v3488_v0, %v143_v12 }
  0xd8   :  { %v141_v16 = vpop.xlane.xlu0 %140 }
  0xd9   :  { %v157_v17 = vsub.f32 %v153_v15, %v155_v14  ;;  %v144_v18 = vmul.f32 0.03125, %v141_v16 }
  0xda   :  { %v152_v19 = vpop.xlane.xlu1 %151 }
  0xdb   :  { %v161_v20 = vadd.f32 1e-12, %v157_v17  ;;  %v156_v21 = vmul.f32 %v144_v18, %v144_v18  ;;  %v154_v22 = vmul.f32 0.03125, %v152_v19  ;;  %v160_v29 = vsub.f32 %v3490_v1, %v144_v18 }
  0xdd   :  { %3145 = vrsqrt.f32 %v161_v20  ;;  %v158_v23 = vsub.f32 %v154_v22, %v156_v21 }
  0xdf   :  { %v162_v24 = vadd.f32 1e-12, %v158_v23 }
  0xe1   :  { %3147 = vrsqrt.f32 %v162_v24 }
  0xea   :  { %v3146_v26 = vpop.eup %3145 }
  0xeb   :  { %v165_v27 = vmul.f32 %v3146_v26, %v159_v25 }
  0xed   :  { %v171_v32 = vmul.f32 %v2658_v28, %v165_v27  ;;  %v3578_v27 = vsel %vm125_vm3, 1.0, %v3381_v9 }
  0xee   :  { %v3148_v30 = vpop.eup %3147 }
  0xef   :  { %v166_v31 = vmul.f32 %v3148_v30, %v160_v29  ;;  %v177_v35 = vadd.f32 %v2659_v33, %v171_v32 }
  0xf1   :  { %v172_v34 = vmul.f32 %v2658_v28, %v166_v31  ;;  %v3584_v31 = vsel %vm126_vm4, 1.0, %v3381_v9 }
  0xf3   :  { %v178_v36 = vadd.f32 %v2659_v33, %v172_v34 }
  0xf5   :  { %v183_v37 = vpack.c.bf16 %v178_v36, %v177_v35 }
  0xf7   :  { %2826 = vmatmul.mubr.msk.bf16.vlgmr.msra.gmra.mxu1 %vm135_vm0, %v183_v37 }
  0xf8   :  { %2831 = vmatprep.mubr.msk.bf16.mxu1 %vm3382_vm1, %v3381_v9 }
 0x1b7   :  { %v238_v39 = vpop.f32.mrf.mxu1 }
 0x1b8   :  { %v239_v40 = vadd.f32 %v2660_v38, %v238_v39 }
 0x1b9   :  { %v2827_v41 = vpop.f32.mrf.mxu1 }
 0x1ba   :  { %v3524_v42 = vpack.c.bf16 %v239_v40, %v239_v40 }
 0x1bb   :  { %v241_v43 = vpop.f32.mrf.mxu1 }
 0x1bc   :  { %v242_v44 = vadd.f32 %v2660_v38, %v241_v43  ;;  %248 = vrot.lane.b32.xlu0 %v3524_v42, %s3383_s1 }
 0x1bd   :  { %v2828_v45 = vpop.f32.mrf.mxu1 }
 0x1be   :  { %v3528_v46 = vpack.c.bf16 %v242_v44, %v242_v44 }
 0x1c0   :  { %298 = vrot.lane.b32.xlu1 %v3528_v46, %s3383_s1 }
 0x22e   :  { %v249_v47 = vpop.permute.xlu0 %248 }
 0x22f   :  { %v255_v48 = vsel %vm250_vm2, %v249_v47, 0 }
 0x230   :  { %2830 = vmatpush3.bf16.xpose.msra.mxu1 %v255_v48 }
 0x231   :  { %2841 = vmatprep.subr.bf16.mxu1 %v3381_v9 }
 0x232   :  { %v299_v49 = vpop.permute.xlu1 %298 }
 0x233   :  { %v304_v50 = vsel %vm250_vm2, %v299_v49, 0 }
 0x234   :  { %2836 = vmatpush3.bf16.xpose.msra.mxu0 %v304_v50 }
 0x235   :  { %2847 = vmatprep.subr.bf16.mxu0 %v3381_v9 }
 0x237   :  { %2832 = vmatmul.mubr.msk.bf16.vlgmr.msra.gmra.mxu1 %vm250_vm2, %v3524_v42 }
 0x238   :  { %2843 = vmatprep.mubr.msk.bf16.mxu1 %vm3382_vm1, %v3381_v9 }
 0x23b   :  { %2838 = vmatmul.mubr.msk.bf16.vlgmr.msra.gmra.mxu0 %vm250_vm2, %v3528_v46 }
 0x23c   :  { %2849 = vmatprep.mubr.msk.bf16.mxu0 %vm3382_vm1, %v3381_v9 }
 0x2f7   :  { %v291_v53 = vpop.f32.mrf.mxu1 }
 0x2f8   :  { %v346_v56 = vmul.f32 0.35355338, %v291_v53 }
 0x2f9   :  { %v2833_v57 = vpop.f32.mrf.mxu1 }
 0x2fa   :  { %v348_v58 = vadd.f32 %v346_v56, %v3547_v55 }
 0x2fb   :  { %v294_v59 = vpop.f32.mrf.mxu1  ;;  %v340_v60 = vpop.f32.mrf.mxu0 }
 0x2fc   :  { %v347_v62 = vmul.f32 0.35355338, %v340_v60  ;;  %v350_v63 = vsel %vm250_vm2, %v348_v58, -inf }
 0x2fd   :  { %v2839_v2 = vpop.f32.mrf.mxu0  ;;  %351 = vmax.xlane.f32.xlu1 %v350_v63  ;;  %v2834_v3 = vpop.f32.mrf.mxu1 }
 0x2fe   :  { %v349_v4 = vadd.f32 %v347_v62, %v3553_v61 }
 0x2ff   :  { %v343_v5 = vpop.f32.mrf.mxu0 }
 0x300   :  { %v353_v6 = vsel %vm250_vm2, %v349_v4, -inf }
 0x301   :  { %354 = vmax.xlane.f32.xlu0 %v353_v6  ;;  %v2840_v7 = vpop.f32.mrf.mxu0 }
 0x30e   :  { %425 = vrot.lane.b32.xlu1 %v3528_v46, %s3375_s23 }
 0x312   :  { %475 = vrot.lane.b32.xlu1 %v3524_v42, %s3385_s30 }
 0x386   :  { %v352_v8 = vpop.xlane.xlu1 %351 }
 0x387   :  { %v356_v10 = vsub.f32 %v348_v58, %v352_v8 }
 0x389   :  { %v358_v11 = vmul.f32 1.442695, %v356_v10 }
 0x38a   :  { %v355_v12 = vpop.xlane.xlu0 %354  ;;  %v426_v13 = vpop.permute.xlu1 %425 }
 0x38b   :  { %3149 = vpow2.f32 %v358_v11  ;;  %v357_v14 = vsub.f32 %v349_v4, %v355_v12  ;;  %v431_v15 = vsel %vm381_vm5, %v426_v13, 0 }
 0x38c   :  { %2848 = vmatpush3.bf16.msra.mxu0 %v431_v15 }
 0x38d   :  { %v360_v16 = vmul.f32 1.442695, %v357_v14  ;;  %2859 = vmatprep.subr.bf16.mxu0 %v3381_v9 }
 0x38e   :  { %v476_v21 = vpop.permute.xlu1 %475 }
 0x38f   :  { %3151 = vpow2.f32 %v360_v16  ;;  %v481_v34 = vsel %vm250_vm2, %v476_v21, 0 }
 0x398   :  { %v3150_v17 = vpop.eup %3149 }
 0x399   :  { %v362_v18 = vsel %vm250_vm2, %v3150_v17, 0.0 }
 0x39a   :  { %363 = vadd.xlane.f32.xlu0 %v362_v18 }
 0x39c   :  { %v3152_v19 = vpop.eup %3151 }
 0x39d   :  { %v365_v20 = vsel %vm250_vm2, %v3152_v19, 0.0 }
 0x39e   :  { %366 = vadd.xlane.f32.xlu1 %v365_v20 }
 0x3af   :  { %525 = vrot.lane.b32.xlu1 %v3528_v46, %s3385_s30 }
 0x3b0   :  { %376 = vrot.lane.b32.xlu0 %v3524_v42, %s3375_s23  ;;  %s3387_s23 = smov 56  }
 0x3b3   :  { %523 = vrot.lane.b32.xlu1 %v3528_v46, %s3386_s11 }
 0x3b4   :  { %473 = vrot.lane.b32.xlu0 %v3524_v42, %s3386_s11 }
 0x423   :  { %v364_v22 = vpop.xlane.xlu0 %363 }
 0x424   :  { %3153 = vrcp.f32 %v364_v22 }
 0x427   :  { %v377_v23 = vpop.permute.xlu0 %376  ;;  %v367_v24 = vpop.xlane.xlu1 %366 }
 0x428   :  { %v383_v25 = vsel %vm381_vm5, %v377_v23, 0  ;;  %3155 = vrcp.f32 %v367_v24 }
 0x429   :  { %2842 = vmatpush3.bf16.msra.mxu1 %v383_v25 }
 0x42a   :  { %2853 = vmatprep.subr.bf16.mxu1 %v3381_v9 }
 0x42b   :  { %v526_v36 = vpop.permute.xlu1 %525  ;;  %v474_v39 = vpop.permute.xlu0 %473 }
 0x42c   :  { %v531_v38 = vsel %vm250_vm2, %v526_v36, 0 }
 0x42f   :  { %v524_v40 = vpop.permute.xlu1 %523 }
 0x431   :  { %v3154_v26 = vpop.eup %3153 }
 0x432   :  { %v370_v28 = vmul.f32 %v3154_v26, %v3150_v17 }
 0x434   :  { %v372_v29 = vmul.f32 %v3578_v27, %v370_v28 }
 0x435   :  { %v3156_v30 = vpop.eup %3155 }
 0x436   :  { %v374_v32 = vpack.c.bf16 %v372_v29, %v372_v29  ;;  %v371_v33 = vmul.f32 %v3156_v30, %v3152_v19 }
 0x438   :  { %2844 = vmatmul.mubr.msk.bf16.vlgmr.msra.gmra.mxu1 %vm250_vm2, %v374_v32  ;;  %v373_v35 = vmul.f32 %v3584_v31, %v371_v33 }
 0x439   :  { %2854 = vmatpush3.bf16.xpose.msra.mxu1 %v481_v34  ;;  %2855 = vmatprep.mubr.msk.bf16.mxu1 %vm3382_vm1, %v3381_v9 }
 0x43a   :  { %v375_v37 = vpack.c.bf16 %v373_v35, %v373_v35  ;;  %2865 = vmatprep.subr.bf16.mxu1 %v3381_v9 }
 0x43c   :  { %2850 = vmatmul.mubr.msk.bf16.vlgmr.msra.gmra.mxu0 %vm250_vm2, %v375_v37 }
 0x43d   :  { %2860 = vmatpush3.bf16.xpose.msra.mxu0 %v531_v38  ;;  %2861 = vmatprep.mubr.msk.bf16.mxu0 %vm3382_vm1, %v3381_v9 }
 0x43e   :  { %2871 = vmatprep.subr.bf16.mxu0 %v3381_v9 }
 0x440   :  { %2856 = vmatmul.mubr.msk.bf16.vlgmr.msra.gmra.mxu1 %vm250_vm2, %v474_v39 }
 0x441   :  { %2867 = vmatprep.mubr.msk.bf16.mxu1 %vm3382_vm1, %v3381_v9 }
 0x444   :  { %2862 = vmatmul.mubr.msk.bf16.vlgmr.msra.gmra.mxu0 %vm250_vm2, %v524_v40 }
 0x445   :  { %2873 = vmatprep.mubr.msk.bf16.mxu0 %vm3382_vm1, %v3381_v9 }
 0x4f8   :  { %v3603_v41 = vpop.f32.mrf.mxu1 }
 0x4fa   :  { %v2845_v43 = vpop.f32.mrf.mxu1 }
 0x4fc   :  { %v422_v44 = vpop.f32.mrf.mxu1  ;;  %v3605_v45 = vpop.f32.mrf.mxu0 }
 0x4fe   :  { %v2846_v47 = vpop.f32.mrf.mxu1  ;;  %v2851_v48 = vpop.f32.mrf.mxu0 }
 0x500   :  { %v470_v49 = vpop.f32.mrf.mxu0  ;;  %v517_v50 = vpop.f32.mrf.mxu1 }
 0x501   :  { %v573_v51 = vmul.f32 0.35355338, %v517_v50 }
 0x502   :  { %v2852_v52 = vpop.f32.mrf.mxu0  ;;  %v2857_v53 = vpop.f32.mrf.mxu1 }
 0x503   :  { %v575_v54 = vadd.f32 %v573_v51, %v3547_v55 }
 0x504   :  { %v520_v56 = vpop.f32.mrf.mxu1  ;;  %v567_v57 = vpop.f32.mrf.mxu0 }
 0x505   :  { %v574_v58 = vmul.f32 0.35355338, %v567_v57  ;;  %v577_v59 = vsel %vm250_vm2, %v575_v54, -inf }
 0x506   :  { %v2863_v60 = vpop.f32.mrf.mxu0  ;;  %578 = vmax.xlane.f32.xlu0 %v577_v59  ;;  %v2858_v62 = vpop.f32.mrf.mxu1 }
 0x507   :  { %v576_v63 = vadd.f32 %v574_v58, %v3553_v61 }
 0x508   :  { %v570_v2 = vpop.f32.mrf.mxu0 }
 0x509   :  { %v580_v3 = vsel %vm250_vm2, %v576_v63, -inf }
 0x50a   :  { %581 = vmax.xlane.f32.xlu1 %v580_v3  ;;  %v2864_v4 = vpop.f32.mrf.mxu0 }
 0x51b   :  { %651 = vrot.lane.b32.xlu1 %v3528_v46, %s3387_s23 }
 0x51f   :  { %701 = vrot.lane.b32.xlu1 %v3524_v42, %s3388_s12 }
 0x523   :  { %751 = vrot.lane.b32.xlu1 %v3528_v46, %s3388_s12 }
 0x527   :  { %749 = vrot.lane.b32.xlu1 %v3528_v46, %s3389_s3 }
 0x58f   :  { %v579_v5 = vpop.xlane.xlu0 %578 }
 0x590   :  { %v583_v6 = vsub.f32 %v575_v54, %v579_v5 }
 0x592   :  { %v585_v7 = vmul.f32 1.442695, %v583_v6 }
 0x593   :  { %v582_v8 = vpop.xlane.xlu1 %581 }
 0x594   :  { %3157 = vpow2.f32 %v585_v7  ;;  %v584_v10 = vsub.f32 %v576_v63, %v582_v8 }
 0x596   :  { %v587_v11 = vmul.f32 1.442695, %v584_v10 }
 0x597   :  { %v652_v12 = vpop.permute.xlu1 %651 }
 0x598   :  { %3159 = vpow2.f32 %v587_v11  ;;  %v657_v13 = vsel %vm381_vm5, %v652_v12, 0 }
 0x599   :  { %2872 = vmatpush3.bf16.msra.mxu0 %v657_v13 }
 0x59a   :  { %2883 = vmatprep.subr.bf16.mxu0 %v3381_v9 }
 0x59b   :  { %v702_v24 = vpop.permute.xlu1 %701 }
 0x59c   :  { %v707_v30 = vsel %vm250_vm2, %v702_v24, 0 }
 0x59f   :  { %v752_v33 = vpop.permute.xlu1 %751 }
 0x5a0   :  { %v757_v35 = vsel %vm250_vm2, %v752_v33, 0 }
 0x5a1   :  { %v3158_v14 = vpop.eup %3157 }
 0x5a2   :  { %v589_v15 = vsel %vm250_vm2, %v3158_v14, 0.0 }
 0x5a3   :  { %590 = vadd.xlane.f32.xlu0 %v589_v15  ;;  %v750_v37 = vpop.permute.xlu1 %749 }
 0x5a5   :  { %v3160_v16 = vpop.eup %3159 }
 0x5a6   :  { %v592_v17 = vsel %vm250_vm2, %v3160_v16, 0.0 }
 0x5a7   :  { %593 = vadd.xlane.f32.xlu0 %v592_v17 }
 0x5bd   :  { %603 = vrot.lane.b32.xlu0 %v3524_v42, %s3387_s23 }
 0x5c1   :  { %699 = vrot.lane.b32.xlu0 %v3524_v42, %s3389_s3 }
 0x62c   :  { %v591_v18 = vpop.xlane.xlu0 %590 }
 0x62d   :  { %3161 = vrcp.f32 %v591_v18 }
 0x630   :  { %v594_v19 = vpop.xlane.xlu0 %593 }
 0x631   :  { %3163 = vrcp.f32 %v594_v19 }
 0x634   :  { %v604_v20 = vpop.permute.xlu0 %603 }
 0x635   :  { %v609_v21 = vsel %vm381_vm5, %v604_v20, 0 }
 0x636   :  { %2866 = vmatpush3.bf16.msra.mxu1 %v609_v21 }
 0x637   :  { %2877 = vmatprep.subr.bf16.mxu1 %v3381_v9 }
 0x638   :  { %v700_v36 = vpop.permute.xlu0 %699 }
 0x63a   :  { %v3162_v22 = vpop.eup %3161 }
 0x63b   :  { %v597_v23 = vmul.f32 %v3162_v22, %v3158_v14 }
 0x63d   :  { %v599_v25 = vmul.f32 %v3578_v27, %v597_v23 }
 0x63e   :  { %v3164_v26 = vpop.eup %3163 }
 0x63f   :  { %v601_v28 = vpack.c.bf16 %v599_v25, %v599_v25  ;;  %v598_v29 = vmul.f32 %v3164_v26, %v3160_v16 }
 0x641   :  { %2868 = vmatmul.mubr.msk.bf16.vlgmr.msra.gmra.mxu1 %vm250_vm2, %v601_v28  ;;  %v600_v32 = vmul.f32 %v3584_v31, %v598_v29 }
 0x642   :  { %2878 = vmatpush3.bf16.xpose.msra.mxu1 %v707_v30  ;;  %2879 = vmatprep.mubr.msk.bf16.mxu1 %vm3382_vm1, %v3381_v9 }
 0x643   :  { %v602_v34 = vpack.c.bf16 %v600_v32, %v600_v32  ;;  %2889 = vmatprep.subr.bf16.mxu1 %v3381_v9 }
 0x645   :  { %2874 = vmatmul.mubr.msk.bf16.vlgmr.msra.gmra.mxu0 %vm250_vm2, %v602_v34 }
 0x646   :  { %2884 = vmatpush3.bf16.xpose.msra.mxu0 %v757_v35  ;;  %2885 = vmatprep.mubr.msk.bf16.mxu0 %vm3382_vm1, %v3381_v9 }
 0x647   :  { %2895 = vmatprep.subr.bf16.mxu0 %v3381_v9 }
 0x649   :  { %2880 = vmatmul.mubr.msk.bf16.vlgmr.msra.gmra.mxu1 %vm250_vm2, %v700_v36 }
 0x64a   :  { %2891 = vmatprep.mubr.msk.bf16.mxu1 %vm3382_vm1, %v3381_v9 }
 0x64d   :  { %2886 = vmatmul.mubr.msk.bf16.vlgmr.msra.gmra.mxu0 %vm250_vm2, %v750_v37 }
 0x64e   :  { %2897 = vmatprep.mubr.msk.bf16.mxu0 %vm3382_vm1, %v3381_v9 }
 0x701   :  { %v3645_v38 = vpop.f32.mrf.mxu1 }
 0x703   :  { %v2869_v39 = vpop.f32.mrf.mxu1 }
 0x705   :  { %v648_v40 = vpop.f32.mrf.mxu1  ;;  %v3647_v43 = vpop.f32.mrf.mxu0 }
 0x706   :  { %v3099_v44 = vpack.i.bf16 %v3647_v43, %v3645_v38 }
 0x707   :  { %v2870_v47 = vpop.f32.mrf.mxu1  ;;  %v2875_v48 = vpop.f32.mrf.mxu0 }
 0x709   :  { %v696_v49 = vpop.f32.mrf.mxu0  ;;  %v743_v50 = vpop.f32.mrf.mxu1 }
 0x70a   :  { %v799_v51 = vmul.f32 0.35355338, %v743_v50 }
 0x70b   :  { %v2876_v52 = vpop.f32.mrf.mxu0  ;;  %v2881_v53 = vpop.f32.mrf.mxu1 }
 0x70c   :  { %v801_v54 = vadd.f32 %v799_v51, %v3547_v55 }
 0x70d   :  { %v746_v56 = vpop.f32.mrf.mxu1  ;;  %v793_v57 = vpop.f32.mrf.mxu0 }
 0x70e   :  { %v800_v58 = vmul.f32 0.35355338, %v793_v57  ;;  %v803_v59 = vsel %vm250_vm2, %v801_v54, -inf }
 0x70f   :  { %v2887_v60 = vpop.f32.mrf.mxu0  ;;  %804 = vmax.xlane.f32.xlu0 %v803_v59  ;;  %v2882_v62 = vpop.f32.mrf.mxu1 }
 0x710   :  { %v802_v63 = vadd.f32 %v800_v58, %v3553_v61 }
 0x711   :  { %v796_v2 = vpop.f32.mrf.mxu0 }
 0x712   :  { %v806_v3 = vsel %vm250_vm2, %v802_v63, -inf }
 0x713   :  { %807 = vmax.xlane.f32.xlu1 %v806_v3  ;;  %v2888_v4 = vpop.f32.mrf.mxu0 }
 0x724   :  { %877 = vrot.lane.b32.xlu1 %v3528_v46, %s3390_s13 }
 0x728   :  { %927 = vrot.lane.b32.xlu1 %v3524_v42, %s3391_s14 }
 0x72c   :  { %977 = vrot.lane.b32.xlu1 %v3528_v46, %s3391_s14 }
 0x730   :  { %975 = vrot.lane.b32.xlu1 %v3528_v46, %s3392_s15 }
 0x798   :  { %v805_v5 = vpop.xlane.xlu0 %804 }
 0x799   :  { %v809_v6 = vsub.f32 %v801_v54, %v805_v5 }
 0x79b   :  { %v811_v7 = vmul.f32 1.442695, %v809_v6 }
 0x79c   :  { %v808_v8 = vpop.xlane.xlu1 %807 }
 0x79d   :  { %3165 = vpow2.f32 %v811_v7  ;;  %v810_v10 = vsub.f32 %v802_v63, %v808_v8 }
 0x79f   :  { %v813_v11 = vmul.f32 1.442695, %v810_v10 }
 0x7a0   :  { %v878_v12 = vpop.permute.xlu1 %877 }
 0x7a1   :  { %3167 = vpow2.f32 %v813_v11  ;;  %v883_v13 = vsel %vm381_vm5, %v878_v12, 0 }
 0x7a2   :  { %2896 = vmatpush3.bf16.msra.mxu0 %v883_v13 }
 0x7a3   :  { %2907 = vmatprep.subr.bf16.mxu0 %v3381_v9 }
 0x7a4   :  { %v928_v24 = vpop.permute.xlu1 %927 }
 0x7a5   :  { %v933_v30 = vsel %vm250_vm2, %v928_v24, 0 }
 0x7a8   :  { %v978_v33 = vpop.permute.xlu1 %977 }
 0x7a9   :  { %v983_v35 = vsel %vm250_vm2, %v978_v33, 0 }
 0x7aa   :  { %v3166_v14 = vpop.eup %3165 }
 0x7ab   :  { %v815_v15 = vsel %vm250_vm2, %v3166_v14, 0.0 }
 0x7ac   :  { %816 = vadd.xlane.f32.xlu0 %v815_v15  ;;  %v976_v37 = vpop.permute.xlu1 %975 }
 0x7ae   :  { %v3168_v16 = vpop.eup %3167 }
 0x7af   :  { %v818_v17 = vsel %vm250_vm2, %v3168_v16, 0.0 }
 0x7b0   :  { %819 = vadd.xlane.f32.xlu0 %v818_v17 }
 0x7c6   :  { %829 = vrot.lane.b32.xlu0 %v3524_v42, %s3390_s13 }
 0x7ca   :  { %925 = vrot.lane.b32.xlu0 %v3524_v42, %s3392_s15 }
 0x835   :  { %v817_v18 = vpop.xlane.xlu0 %816 }
 0x836   :  { %3169 = vrcp.f32 %v817_v18 }
 0x839   :  { %v820_v19 = vpop.xlane.xlu0 %819 }
 0x83a   :  { %3171 = vrcp.f32 %v820_v19 }
 0x83d   :  { %v830_v20 = vpop.permute.xlu0 %829 }
 0x83e   :  { %v835_v21 = vsel %vm381_vm5, %v830_v20, 0 }
 0x83f   :  { %2890 = vmatpush3.bf16.msra.mxu1 %v835_v21 }
 0x840   :  { %2901 = vmatprep.subr.bf16.mxu1 %v3381_v9 }
 0x841   :  { %v926_v36 = vpop.permute.xlu0 %925 }
 0x843   :  { %v3170_v22 = vpop.eup %3169 }
 0x844   :  { %v823_v23 = vmul.f32 %v3170_v22, %v3166_v14 }
 0x846   :  { %v825_v25 = vmul.f32 %v3578_v27, %v823_v23 }
 0x847   :  { %v3172_v26 = vpop.eup %3171 }
 0x848   :  { %v827_v28 = vpack.c.bf16 %v825_v25, %v825_v25  ;;  %v824_v29 = vmul.f32 %v3172_v26, %v3168_v16 }
 0x84a   :  { %2892 = vmatmul.mubr.msk.bf16.vlgmr.msra.gmra.mxu1 %vm250_vm2, %v827_v28  ;;  %v826_v32 = vmul.f32 %v3584_v31, %v824_v29  ;;  %v3131_v29 = vld [vmem:[%s4047_s5 + $0x8] sm:$0xff]  }
 0x84b   :  { %2902 = vmatpush3.bf16.xpose.msra.mxu1 %v933_v30  ;;  %2903 = vmatprep.mubr.msk.bf16.mxu1 %vm3382_vm1, %v3381_v9  ;;  %v3132_v30 = vld [vmem:[%s4047_s5] sm:$0xff]  }
 0x84c   :  { %v828_v34 = vpack.c.bf16 %v826_v32, %v826_v32  ;;  %2913 = vmatprep.subr.bf16.mxu1 %v3381_v9 }
 0x84e   :  { %2898 = vmatmul.mubr.msk.bf16.vlgmr.msra.gmra.mxu0 %vm250_vm2, %v828_v34 }
 0x84f   :  { %2908 = vmatpush3.bf16.xpose.msra.mxu0 %v983_v35  ;;  %2909 = vmatprep.mubr.msk.bf16.mxu0 %vm3382_vm1, %v3381_v9 }
 0x850   :  { %2919 = vmatprep.subr.bf16.mxu0 %v3381_v9 }
 0x852   :  { %2904 = vmatmul.mubr.msk.bf16.vlgmr.msra.gmra.mxu1 %vm250_vm2, %v926_v36 }
 0x853   :  { %2915 = vmatprep.mubr.msk.bf16.mxu1 %vm3382_vm1, %v3381_v9 }
 0x856   :  { %2910 = vmatmul.mubr.msk.bf16.vlgmr.msra.gmra.mxu0 %vm250_vm2, %v976_v37 }
 0x857   :  { %2921 = vmatprep.mubr.msk.bf16.mxu0 %vm3382_vm1, %v3381_v9 }
 0x90a   :  { %v871_v39 = vpop.f32.mrf.mxu1 }
 0x90c   :  { %v2893_v40 = vpop.f32.mrf.mxu1 }
 0x90e   :  { %v874_v47 = vpop.f32.mrf.mxu1  ;;  %v919_v48 = vpop.f32.mrf.mxu0 }
 0x90f   :  { %v3104_v7 = vpack.i.bf16 %v919_v48, %v871_v39 }
 0x910   :  { %v2894_v49 = vpop.f32.mrf.mxu1  ;;  %v2899_v50 = vpop.f32.mrf.mxu0 }
 0x912   :  { %v922_v51 = vpop.f32.mrf.mxu0  ;;  %v969_v52 = vpop.f32.mrf.mxu1 }
 0x913   :  { %v1025_v53 = vmul.f32 0.35355338, %v969_v52 }
 0x914   :  { %v2900_v54 = vpop.f32.mrf.mxu0  ;;  %v2905_v56 = vpop.f32.mrf.mxu1 }
 0x915   :  { %v1027_v57 = vadd.f32 %v1025_v53, %v3547_v55 }
 0x916   :  { %v972_v58 = vpop.f32.mrf.mxu1  ;;  %v1019_v59 = vpop.f32.mrf.mxu0 }
 0x917   :  { %v1026_v60 = vmul.f32 0.35355338, %v1019_v59  ;;  %v1029_v62 = vsel %vm250_vm2, %v1027_v57, -inf }
 0x918   :  { %v2911_v63 = vpop.f32.mrf.mxu0  ;;  %1030 = vmax.xlane.f32.xlu0 %v1029_v62  ;;  %v2906_v2 = vpop.f32.mrf.mxu1 }
 0x919   :  { %v1028_v3 = vadd.f32 %v1026_v60, %v3553_v61 }
 0x91a   :  { %v1022_v4 = vpop.f32.mrf.mxu0 }
 0x91b   :  { %v1032_v5 = vsel %vm250_vm2, %v1028_v3, -inf }
 0x91c   :  { %1033 = vmax.xlane.f32.xlu1 %v1032_v5  ;;  %v2912_v6 = vpop.f32.mrf.mxu0 }
 0x92d   :  { %1103 = vrot.lane.b32.xlu1 %v3528_v46, %s3393_s16 }
 0x931   :  { %3100 = vrot.lane.b32.xlu1 %v3099_v44, %s3374_s19 }
 0x935   :  { %3105 = vrot.lane.b32.xlu1 %v3104_v7, %s3394_s17 }
 0x9a1   :  { %v1031_v8 = vpop.xlane.xlu0 %1030 }
 0x9a2   :  { %v1035_v10 = vsub.f32 %v1027_v57, %v1031_v8 }
 0x9a4   :  { %v1037_v11 = vmul.f32 1.442695, %v1035_v10 }
 0x9a5   :  { %v1034_v12 = vpop.xlane.xlu1 %1033 }
 0x9a6   :  { %3173 = vpow2.f32 %v1037_v11  ;;  %v1036_v13 = vsub.f32 %v1028_v3, %v1034_v12 }
 0x9a8   :  { %v1039_v14 = vmul.f32 1.442695, %v1036_v13 }
 0x9a9   :  { %v1104_v15 = vpop.permute.xlu1 %1103 }
 0x9aa   :  { %3175 = vpow2.f32 %v1039_v14  ;;  %v1109_v46 = vsel %vm381_vm5, %v1104_v15, 0 }
 0x9ab   :  { %2920 = vmatpush3.bf16.msra.mxu0 %v1109_v46  ;;  %v3133_v46 = vld [vmem:[#allocation10 + $0x8] sm:$0xff]  }
 0x9ac   :  { %2933 = vmatprep.subr.bf16.mxu0 %v3381_v9 }
 0x9ad   :  { %v3101_v48 = vpop.permute.xlu1 %3100 }
 0x9ae   :  { %v3103_v50 = vunpack.i.h.bf16 %v3101_v48  ;;  %v3102_v51 = vunpack.i.l.bf16 %v3101_v48 }
 0x9b0   :  { %v1176_v56 = vsel %vm250_vm2, %v3605_v45, %v3103_v50  ;;  %v1175_v57 = vsel %vm250_vm2, %v3603_v41, %v3102_v51  ;;  %v2683_v41 = vld [vmem:[%s4050_s8 + $0x1] ss:$0 sm:$0xff] }
 0x9b1   :  { %v3106_v49 = vpop.permute.xlu1 %3105 }
 0x9b2   :  { %v3108_v52 = vunpack.i.h.bf16 %v3106_v49  ;;  %v3107_v53 = vunpack.i.l.bf16 %v3106_v49  ;;  %v2685_v49 = vld [vmem:[%s4051_s9 + $0x4] ss:$0 sm:$0xff] }
 0x9b3   :  { %v3174_v38 = vpop.eup %3173 }
 0x9b4   :  { %v1041_v43 = vsel %vm250_vm2, %v3174_v38, 0.0  ;;  %v1179_v60 = vsel %vm1177_vm6, %v1176_v56, %v3108_v52  ;;  %v1178_v62 = vsel %vm1177_vm6, %v1175_v57, %v3107_v53 }
 0x9b5   :  { %1042 = vadd.xlane.f32.xlu0 %v1041_v43  ;;  %v121_v43 = vld [vmem:[#allocation7] sm:$0xff] }
 0x9b7   :  { %v3176_v44 = vpop.eup %3175 }
 0x9b8   :  { %v1044_v16 = vsel %vm250_vm2, %v3176_v44, 0.0 }
 0x9b9   :  { %1045 = vadd.xlane.f32.xlu0 %v1044_v16 }
 0x9cf   :  { %1055 = vrot.lane.b32.xlu0 %v3524_v42, %s3393_s16 }
 0xa3e   :  { %v1043_v17 = vpop.xlane.xlu0 %1042 }
 0xa3f   :  { %3177 = vrcp.f32 %v1043_v17  ;;  %v3135_v17 = vld [vmem:[%s4047_s5 + $0x18] sm:$0xff]  }
 0xa42   :  { %v1046_v18 = vpop.xlane.xlu0 %1045 }
 0xa43   :  { %3179 = vrcp.f32 %v1046_v18  ;;  %v3136_v18 = vld [vmem:[%s4047_s5 + $0x10] sm:$0xff]  }
 0xa46   :  { %v1056_v19 = vpop.permute.xlu0 %1055 }
 0xa47   :  { %v1061_v20 = vsel %vm381_vm5, %v1056_v19, 0 }
 0xa48   :  { %2914 = vmatpush3.bf16.msra.mxu1 %v1061_v20 }
 0xa49   :  { %2925 = vmatprep.subr.bf16.mxu1 %v3381_v9 }
 0xa4c   :  { %v3178_v21 = vpop.eup %3177 }
 0xa4d   :  { %v1049_v22 = vmul.f32 %v3178_v21, %v3174_v38  ;;  %v3134_v38 = vld [vmem:[#allocation10] sm:$0xff]  }
 0xa4f   :  { %v1051_v23 = vmul.f32 %v3578_v27, %v1049_v22 }
 0xa50   :  { %v3180_v24 = vpop.eup %3179 }
 0xa51   :  { %v1053_v25 = vpack.c.bf16 %v1051_v23, %v1051_v23  ;;  %v1050_v26 = vmul.f32 %v3180_v24, %v3176_v44  ;;  %v122_v44 = vld [vmem:[#allocation7 + $0x8] sm:$0xff] }
 0xa52   :  { %v1368_v16 = vpack.c.bf16 %v122_v44, %v121_v43 }
 0xa53   :  { %2916 = vmatmul.mubr.msk.bf16.vlgmr.msra.gmra.mxu1 %vm250_vm2, %v1053_v25  ;;  %v1052_v42 = vmul.f32 %v3584_v31, %v1050_v26 }
 0xa54   :  { %2929 = vmatprep.mubr.msk.bf16.mxu1 %vm3382_vm1, %v3381_v9  ;;  %2926 = vmatpush3.bf16.msra.mxu1 %v3131_v29 }
 0xa55   :  { %v1054_v28 = vpack.c.bf16 %v1052_v42, %v1052_v42  ;;  %2927 = vmatprep.subr.bf16.mxu1 %v3381_v9 }
 0xa57   :  { %2922 = vmatmul.mubr.msk.bf16.vlgmr.msra.gmra.mxu0 %vm250_vm2, %v1054_v28 }
 0xa58   :  { %2937 = vmatprep.mubr.msk.bf16.mxu0 %vm3382_vm1, %v3381_v9  ;;  %2928 = vmatpush3.bf16.msra.mxu1 %v3132_v30 }
 0xa59   :  { %2941 = vmatprep.subr.bf16.mxu1 %v3381_v9  ;;  %2934 = vmatpush3.bf16.msra.mxu0 %v3135_v17 }
 0xa5a   :  { %2935 = vmatprep.subr.bf16.mxu0 %v3381_v9 }
 0xa5d   :  { %2936 = vmatpush3.bf16.msra.mxu0 %v3136_v18 }
 0xa5e   :  { %2949 = vmatprep.subr.bf16.mxu0 %v3381_v9 }
 0xb13   :  { %v1097_v32 = vpop.f32.mrf.mxu1 }
 0xb15   :  { %v2917_v33 = vpop.f32.mrf.mxu1 }
 0xb17   :  { %v1100_v34 = vpop.f32.mrf.mxu1  ;;  %v1145_v35 = vpop.f32.mrf.mxu0 }
 0xb18   :  { %v3109_v36 = vpack.i.bf16 %v1145_v35, %v1097_v32 }
 0xb19   :  { %v2918_v37 = vpop.f32.mrf.mxu1  ;;  %v2923_v39 = vpop.f32.mrf.mxu0 }
 0xb1a   :  { %3110 = vrot.lane.b32.xlu0 %v3109_v36, %s3395_s2  ;;  %v2684_v37 = vld [vmem:[%s4051_s9 + $0x1] ss:$0 sm:$0xff] }
 0xb1b   :  { %v1148_v40 = vpop.f32.mrf.mxu0 }
 0xb1d   :  { %v2924_v47 = vpop.f32.mrf.mxu0 }
 0xb8c   :  { %v3111_v54 = vpop.permute.xlu0 %3110 }
 0xb8d   :  { %v3113_v58 = vunpack.i.h.bf16 %v3111_v54  ;;  %v3112_v59 = vunpack.i.l.bf16 %v3111_v54  ;;  %v2694_v54 = vld [vmem:[%s4050_s8 + $0x3] ss:$0 sm:$0xff] }
 0xb8f   :  { %v1182_v63 = vsel %vm1180_vm7, %v1179_v60, %v3113_v58  ;;  %v1181_v2 = vsel %vm1180_vm7, %v1178_v62, %v3112_v59 }
 0xb90   :  { %v1187_v3 = vpack.c.bf16 %v1182_v63, %v1181_v2 }
 0xb92   :  { %2930 = vmatmul.mubr.msk.bf16.vlgmr.msra.gmra.mxu1 %vm135_vm0, %v1187_v3 }
 0xb93   :  { %2945 = vmatprep.mubr.msk.bf16.mxu1 %vm3382_vm1, %v3381_v9  ;;  %2942 = vmatpush3.bf16.msra.mxu1 %v3133_v46 }
 0xb94   :  { %2943 = vmatprep.subr.bf16.mxu1 %v3381_v9 }
 0xb97   :  { %2944 = vmatpush3.bf16.msra.mxu1 %v3134_v38 }
 0xb98   :  { %2955 = vmatprep.subr.bf16.mxu1 %v3381_v9 }
 0xb9a   :  { %2946 = vmatmul.mubr.msk.bf16.vlgmr.msra.gmra.mxu1 %vm135_vm0, %v1368_v16 }
 0xb9b   :  { %2957 = vmatprep.mubr.msk.bf16.mxu1 %vm3382_vm1, %v3381_v9 }
 0xc52   :  { %v1237_v45 = vpop.f32.mrf.mxu1 }
 0xc53   :  { %v1244_v4 = vadd.f32 %v1237_v45, %v3488_v0 }
 0xc54   :  { %v2931_v5 = vpop.f32.mrf.mxu1 }
 0xc55   :  { %v3738_v6 = vadd.f32 %v2683_v41, %v1244_v4 }
 0xc56   :  { %v1240_v7 = vpop.f32.mrf.mxu1 }
 0xc57   :  { %v1245_v8 = vadd.f32 %v1240_v7, %v3490_v1  ;;  %v1255_v10 = vsel %vm135_vm0, %v3738_v6, 0.0  ;;  %v1263_v11 = vmul.f32 %v3738_v6, %v3738_v6 }
 0xc58   :  { %1256 = vadd.xlane.f32.xlu1 %v1255_v10  ;;  %v2932_v12 = vpop.f32.mrf.mxu1 }
 0xc59   :  { %v3745_v13 = vadd.f32 %v2683_v41, %v1245_v8  ;;  %v1265_v14 = vsel %vm135_vm0, %v1263_v11, 0.0  ;;  %v2690_v41 = vld [vmem:[%s4050_s8 + $0x2] ss:$0 sm:$0xff] }
 0xc5a   :  { %1266 = vadd.xlane.f32.xlu0 %v1265_v14  ;;  %v1423_v56 = vpop.f32.mrf.mxu1 }
 0xc5b   :  { %v1258_v0 = vsel %vm135_vm0, %v3745_v13, 0.0  ;;  %v1264_v15 = vmul.f32 %v3745_v13, %v3745_v13  ;;  %v1424_v57 = vadd.f32 %v2694_v54, %v1423_v56 }
 0xc5c   :  { %v2947_v58 = vpop.f32.mrf.mxu1 }
 0xc5d   :  { %v1268_v1 = vsel %vm135_vm0, %v1264_v15, 0.0  ;;  %v3780_v59 = vpack.c.bf16 %v1424_v57, %v1424_v57 }
 0xc5e   :  { %1259 = vadd.xlane.f32.xlu0 %v1258_v0  ;;  %v1426_v60 = vpop.f32.mrf.mxu1 }
 0xc5f   :  { %v1427_v62 = vadd.f32 %v2694_v54, %v1426_v60  ;;  %v1438_v63 = vsel %vm250_vm2, %v3780_v59, 0 }
 0xc60   :  { %v2948_v2 = vpop.f32.mrf.mxu1 }
 0xc61   :  { %v3784_v3 = vpack.c.bf16 %v1427_v62, %v1427_v62 }
 0xc62   :  { %1269 = vadd.xlane.f32.xlu0 %v1268_v1 }
 0xc63   :  { %v1484_v45 = vsel %vm250_vm2, %v3784_v3, 0 }
 0xc64   :  { %2956 = vmatpush3.bf16.xpose.msra.mxu1 %v1484_v45 }
 0xc65   :  { %2967 = vmatprep.subr.bf16.mxu1 %v3381_v9 }
 0xce1   :  { %v1257_v19 = vpop.xlane.xlu1 %1256 }
 0xce2   :  { %v1261_v20 = vmul.f32 0.03125, %v1257_v19 }
 0xce3   :  { %v1267_v21 = vpop.xlane.xlu0 %1266 }
 0xce4   :  { %v1273_v22 = vmul.f32 %v1261_v20, %v1261_v20  ;;  %v1271_v23 = vmul.f32 0.03125, %v1267_v21  ;;  %v1277_v35 = vsub.f32 %v3738_v6, %v1261_v20 }
 0xce6   :  { %v1275_v24 = vsub.f32 %v1271_v23, %v1273_v22 }
 0xce7   :  { %v1260_v25 = vpop.xlane.xlu0 %1259 }
 0xce8   :  { %v1279_v26 = vadd.f32 1e-12, %v1275_v24  ;;  %v1262_v42 = vmul.f32 0.03125, %v1260_v25 }
 0xcea   :  { %3181 = vrsqrt.f32 %v1279_v26  ;;  %v1274_v29 = vmul.f32 %v1262_v42, %v1262_v42  ;;  %v1278_v39 = vsub.f32 %v3745_v13, %v1262_v42 }
 0xceb   :  { %v1270_v28 = vpop.xlane.xlu0 %1269 }
 0xcec   :  { %v1272_v30 = vmul.f32 0.03125, %v1270_v28 }
 0xcee   :  { %v1276_v32 = vsub.f32 %v1272_v30, %v1274_v29 }
 0xcf0   :  { %v1280_v33 = vadd.f32 1e-12, %v1276_v32 }
 0xcf2   :  { %3183 = vrsqrt.f32 %v1280_v33 }
 0xcf7   :  { %v3182_v34 = vpop.eup %3181 }
 0xcf8   :  { %v1283_v36 = vmul.f32 %v3182_v34, %v1277_v35 }
 0xcfa   :  { %v1289_v48 = vmul.f32 %v2684_v37, %v1283_v36 }
 0xcfc   :  { %v1295_v51 = vadd.f32 %v2685_v49, %v1289_v48 }
 0xcff   :  { %v3184_v40 = vpop.eup %3183 }
 0xd00   :  { %v1284_v47 = vmul.f32 %v3184_v40, %v1278_v39 }
 0xd02   :  { %v1290_v50 = vmul.f32 %v2684_v37, %v1284_v47 }
 0xd04   :  { %v1296_v52 = vadd.f32 %v2685_v49, %v1290_v50 }
 0xd06   :  { %v1302_v53 = vpack.c.bf16 %v1296_v52, %v1295_v51 }
 0xd08   :  { %2938 = vmatmul.mubr.msk.bf16.vlgmr.msra.gmra.mxu0 %vm135_vm0, %v1302_v53 }
 0xd09   :  { %2951 = vmatprep.mubr.msk.bf16.mxu0 %vm3382_vm1, %v3381_v9  ;;  %2950 = vmatpush3.bf16.xpose.msra.mxu0 %v1438_v63 }
 0xd0a   :  { %2961 = vmatprep.subr.bf16.mxu0 %v3381_v9 }
 0xdc8   :  { %v1357_v4 = vpop.f32.mrf.mxu0 }
 0xdc9   :  { %v1358_v5 = vadd.f32 %v2690_v41, %v1357_v4 }
 0xdca   :  { %v2939_v7 = vpop.f32.mrf.mxu0 }
 0xdcb   :  { %v3793_v8 = vpack.c.bf16 %v1358_v5, %v1358_v5 }
 0xdcc   :  { %v1360_v10 = vpop.f32.mrf.mxu0 }
 0xdcd   :  { %v1361_v11 = vadd.f32 %v2690_v41, %v1360_v10  ;;  %2952 = vmatmul.mubr.msk.bf16.vlgmr.msra.gmra.mxu0 %vm250_vm2, %v3793_v8 }
 0xdce   :  { %v2940_v12 = vpop.f32.mrf.mxu0  ;;  %2963 = vmatprep.mubr.msk.bf16.mxu0 %vm3382_vm1, %v3381_v9 }
 0xdcf   :  { %v3799_v14 = vpack.c.bf16 %v1361_v11, %v1361_v11 }
 0xdd1   :  { %2958 = vmatmul.mubr.msk.bf16.vlgmr.msra.gmra.mxu1 %vm250_vm2, %v3799_v14 }
 0xdd2   :  { %2969 = vmatprep.mubr.msk.bf16.mxu1 %vm3382_vm1, %v3381_v9 }
 0xe8d   :  { %v1474_v0 = vpop.f32.mrf.mxu0 }
 0xe8e   :  { %v1526_v15 = vmul.f32 0.35355338, %v1474_v0 }
 0xe8f   :  { %v2953_v1 = vpop.f32.mrf.mxu0 }
 0xe90   :  { %v1528_v46 = vadd.f32 %v1526_v15, %v3547_v55 }
 0xe91   :  { %v1477_v38 = vpop.f32.mrf.mxu0  ;;  %v1520_v43 = vpop.f32.mrf.mxu1 }
 0xe92   :  { %v1527_v44 = vmul.f32 0.35355338, %v1520_v43  ;;  %v1530_v16 = vsel %vm250_vm2, %v1528_v46, -inf }
 0xe93   :  { %1531 = vmax.xlane.f32.xlu1 %v1530_v16  ;;  %v2954_v17 = vpop.f32.mrf.mxu0  ;;  %v2959_v18 = vpop.f32.mrf.mxu1 }
 0xe94   :  { %v1529_v19 = vadd.f32 %v1527_v44, %v3553_v61 }
 0xe95   :  { %v1523_v20 = vpop.f32.mrf.mxu1 }
 0xe96   :  { %v1533_v21 = vsel %vm250_vm2, %v1529_v19, -inf }
 0xe97   :  { %1534 = vmax.xlane.f32.xlu0 %v1533_v21  ;;  %v2960_v22 = vpop.f32.mrf.mxu1 }
 0xea4   :  { %1557 = vrot.lane.b32.xlu1 %v3780_v59, %s3383_s1 }
 0xf1c   :  { %v1532_v23 = vpop.xlane.xlu1 %1531 }
 0xf1d   :  { %v1536_v24 = vsub.f32 %v1528_v46, %v1532_v23 }
 0xf1f   :  { %v1538_v25 = vmul.f32 1.442695, %v1536_v24 }
 0xf20   :  { %v1558_v26 = vpop.permute.xlu1 %1557  ;;  %v1535_v42 = vpop.xlane.xlu0 %1534 }
 0xf21   :  { %3185 = vpow2.f32 %v1538_v25  ;;  %v1563_v28 = vsel %vm381_vm5, %v1558_v26, 0  ;;  %v1537_v29 = vsub.f32 %v1529_v19, %v1535_v42 }
 0xf22   :  { %2962 = vmatpush3.bf16.msra.mxu0 %v1563_v28 }
 0xf23   :  { %v1540_v30 = vmul.f32 1.442695, %v1537_v29  ;;  %2973 = vmatprep.subr.bf16.mxu0 %v3381_v9 }
 0xf25   :  { %3187 = vpow2.f32 %v1540_v30 }
 0xf2e   :  { %v3186_v32 = vpop.eup %3185 }
 0xf2f   :  { %v1542_v33 = vsel %vm250_vm2, %v3186_v32, 0.0 }
 0xf30   :  { %1543 = vadd.xlane.f32.xlu1 %v1542_v33 }
 0xf32   :  { %v3188_v34 = vpop.eup %3187 }
 0xf33   :  { %v1545_v35 = vsel %vm250_vm2, %v3188_v34, 0.0 }
 0xf34   :  { %1546 = vadd.xlane.f32.xlu0 %v1545_v35 }
 0xf41   :  { %1657 = vrot.lane.b32.xlu1 %v3780_v59, %s3386_s11 }
 0xf45   :  { %1708 = vrot.lane.b32.xlu1 %v3784_v3, %s3386_s11 }
 0xf49   :  { %1655 = vrot.lane.b32.xlu1 %v3793_v8, %s3386_s11 }
 0xf4a   :  { %1606 = vrot.lane.b32.xlu0 %v3784_v3, %s3383_s1 }
 0xf4e   :  { %1706 = vrot.lane.b32.xlu0 %v3799_v14, %s3386_s11 }
 0xfb9   :  { %v1544_v36 = vpop.xlane.xlu1 %1543 }
 0xfba   :  { %3189 = vrcp.f32 %v1544_v36 }
 0xfbd   :  { %v1547_v37 = vpop.xlane.xlu0 %1546  ;;  %v1658_v49 = vpop.permute.xlu1 %1657 }
 0xfbe   :  { %3191 = vrcp.f32 %v1547_v37  ;;  %v1663_v54 = vsel %vm250_vm2, %v1658_v49, 0 }
 0xfc1   :  { %v1607_v39 = vpop.permute.xlu0 %1606  ;;  %v1709_v57 = vpop.permute.xlu1 %1708 }
 0xfc2   :  { %v1612_v40 = vsel %vm381_vm5, %v1607_v39, 0  ;;  %v1714_v60 = vsel %vm250_vm2, %v1709_v57, 0 }
 0xfc3   :  { %2968 = vmatpush3.bf16.msra.mxu1 %v1612_v40 }
 0xfc4   :  { %2979 = vmatprep.subr.bf16.mxu1 %v3381_v9 }
 0xfc5   :  { %v1656_v62 = vpop.permute.xlu1 %1655  ;;  %v1707_v63 = vpop.permute.xlu0 %1706 }
 0xfc7   :  { %v3190_v47 = vpop.eup %3189 }
 0xfc8   :  { %v1550_v48 = vmul.f32 %v3190_v47, %v3186_v32 }
 0xfca   :  { %v1552_v50 = vmul.f32 %v3578_v27, %v1550_v48 }
 0xfcb   :  { %v3192_v51 = vpop.eup %3191 }
 0xfcc   :  { %v1554_v52 = vpack.c.bf16 %v1552_v50, %v1552_v50  ;;  %v1551_v53 = vmul.f32 %v3192_v51, %v3188_v34 }
 0xfce   :  { %2964 = vmatmul.mubr.msk.bf16.vlgmr.msra.gmra.mxu0 %vm250_vm2, %v1554_v52  ;;  %v1553_v56 = vmul.f32 %v3584_v31, %v1551_v53 }
 0xfcf   :  { %2974 = vmatpush3.bf16.xpose.msra.mxu0 %v1663_v54  ;;  %2975 = vmatprep.mubr.msk.bf16.mxu0 %vm3382_vm1, %v3381_v9 }
 0xfd0   :  { %v1555_v58 = vpack.c.bf16 %v1553_v56, %v1553_v56  ;;  %2985 = vmatprep.subr.bf16.mxu0 %v3381_v9 }
 0xfd2   :  { %2970 = vmatmul.mubr.msk.bf16.vlgmr.msra.gmra.mxu1 %vm250_vm2, %v1555_v58 }
 0xfd3   :  { %2980 = vmatpush3.bf16.xpose.msra.mxu1 %v1714_v60  ;;  %2981 = vmatprep.mubr.msk.bf16.mxu1 %vm3382_vm1, %v3381_v9 }
 0xfd4   :  { %2991 = vmatprep.subr.bf16.mxu1 %v3381_v9 }
 0xfd6   :  { %2976 = vmatmul.mubr.msk.bf16.vlgmr.msra.gmra.mxu0 %vm250_vm2, %v1656_v62 }
 0xfd7   :  { %2987 = vmatprep.mubr.msk.bf16.mxu0 %vm3382_vm1, %v3381_v9 }
 0xfda   :  { %2982 = vmatmul.mubr.msk.bf16.vlgmr.msra.gmra.mxu1 %vm250_vm2, %v1707_v63 }
 0xfdb   :  { %2993 = vmatprep.mubr.msk.bf16.mxu1 %vm3382_vm1, %v3381_v9 }
0x108e   :  { %v3845_v2 = vpop.f32.mrf.mxu0 }
0x1090   :  { %v2965_v45 = vpop.f32.mrf.mxu0 }
0x1092   :  { %v1602_v41 = vpop.f32.mrf.mxu0  ;;  %v3847_v4 = vpop.f32.mrf.mxu1 }
0x1094   :  { %v2966_v5 = vpop.f32.mrf.mxu0  ;;  %v2971_v7 = vpop.f32.mrf.mxu1 }
0x1096   :  { %v1651_v10 = vpop.f32.mrf.mxu1  ;;  %v1699_v11 = vpop.f32.mrf.mxu0 }
0x1097   :  { %v1756_v12 = vmul.f32 0.35355338, %v1699_v11 }
0x1098   :  { %v2972_v0 = vpop.f32.mrf.mxu1  ;;  %v2977_v15 = vpop.f32.mrf.mxu0 }
0x1099   :  { %v1758_v1 = vadd.f32 %v1756_v12, %v3547_v55 }
0x109a   :  { %v1702_v46 = vpop.f32.mrf.mxu0  ;;  %v1750_v38 = vpop.f32.mrf.mxu1 }
0x109b   :  { %v1757_v43 = vmul.f32 0.35355338, %v1750_v38  ;;  %v1760_v44 = vsel %vm250_vm2, %v1758_v1, -inf }
0x109c   :  { %1761 = vmax.xlane.f32.xlu1 %v1760_v44  ;;  %v2978_v16 = vpop.f32.mrf.mxu0  ;;  %v2983_v17 = vpop.f32.mrf.mxu1 }
0x109d   :  { %v1759_v18 = vadd.f32 %v1757_v43, %v3553_v61 }
0x109e   :  { %v1753_v19 = vpop.f32.mrf.mxu1 }
0x109f   :  { %v1763_v20 = vsel %vm250_vm2, %v1759_v18, -inf }
0x10a0   :  { %1764 = vmax.xlane.f32.xlu0 %v1763_v20  ;;  %v2984_v21 = vpop.f32.mrf.mxu1 }
0x10ad   :  { %1786 = vrot.lane.b32.xlu1 %v3780_v59, %s3385_s30 }
0x10b1   :  { %1884 = vrot.lane.b32.xlu1 %v3780_v59, %s3389_s3 }
0x10b5   :  { %1934 = vrot.lane.b32.xlu1 %v3784_v3, %s3389_s3 }
0x10b9   :  { %1882 = vrot.lane.b32.xlu1 %v3793_v8, %s3389_s3 }
0x1125   :  { %v1762_v22 = vpop.xlane.xlu1 %1761 }
0x1126   :  { %v1766_v23 = vsub.f32 %v1758_v1, %v1762_v22 }
0x1128   :  { %v1768_v24 = vmul.f32 1.442695, %v1766_v23 }
0x1129   :  { %v1787_v25 = vpop.permute.xlu1 %1786  ;;  %v1765_v26 = vpop.xlane.xlu0 %1764 }
0x112a   :  { %3193 = vpow2.f32 %v1768_v24  ;;  %v1792_v42 = vsel %vm381_vm5, %v1787_v25, 0  ;;  %v1767_v28 = vsub.f32 %v1759_v18, %v1765_v26 }
0x112b   :  { %2986 = vmatpush3.bf16.msra.mxu0 %v1792_v42 }
0x112c   :  { %v1770_v29 = vmul.f32 1.442695, %v1767_v28  ;;  %2997 = vmatprep.subr.bf16.mxu0 %v3381_v9 }
0x112d   :  { %v1885_v48 = vpop.permute.xlu1 %1884 }
0x112e   :  { %3195 = vpow2.f32 %v1770_v29  ;;  %v1890_v53 = vsel %vm250_vm2, %v1885_v48, 0 }
0x1131   :  { %v1935_v56 = vpop.permute.xlu1 %1934 }
0x1132   :  { %v1940_v58 = vsel %vm250_vm2, %v1935_v56, 0 }
0x1135   :  { %v1883_v60 = vpop.permute.xlu1 %1882 }
0x1137   :  { %v3194_v30 = vpop.eup %3193 }
0x1138   :  { %v1772_v32 = vsel %vm250_vm2, %v3194_v30, 0.0 }
0x1139   :  { %1773 = vadd.xlane.f32.xlu0 %v1772_v32 }
0x113b   :  { %v3196_v33 = vpop.eup %3195 }
0x113c   :  { %v1775_v34 = vsel %vm250_vm2, %v3196_v33, 0.0 }
0x113d   :  { %1776 = vadd.xlane.f32.xlu0 %v1775_v34 }
0x1153   :  { %1834 = vrot.lane.b32.xlu0 %v3784_v3, %s3385_s30 }
0x1157   :  { %1932 = vrot.lane.b32.xlu0 %v3799_v14, %s3389_s3 }
0x11c2   :  { %v1774_v35 = vpop.xlane.xlu0 %1773 }
0x11c3   :  { %3197 = vrcp.f32 %v1774_v35 }
0x11c6   :  { %v1777_v36 = vpop.xlane.xlu0 %1776 }
0x11c7   :  { %3199 = vrcp.f32 %v1777_v36 }
0x11ca   :  { %v1835_v37 = vpop.permute.xlu0 %1834 }
0x11cb   :  { %v1840_v39 = vsel %vm381_vm5, %v1835_v37, 0 }
0x11cc   :  { %2992 = vmatpush3.bf16.msra.mxu1 %v1840_v39 }
0x11cd   :  { %3003 = vmatprep.subr.bf16.mxu1 %v3381_v9 }
0x11ce   :  { %v1933_v62 = vpop.permute.xlu0 %1932 }
0x11d0   :  { %v3198_v40 = vpop.eup %3197 }
0x11d1   :  { %v1780_v47 = vmul.f32 %v3198_v40, %v3194_v30 }
0x11d3   :  { %v1782_v49 = vmul.f32 %v3578_v27, %v1780_v47 }
0x11d4   :  { %v3200_v50 = vpop.eup %3199 }
0x11d5   :  { %v1784_v51 = vpack.c.bf16 %v1782_v49, %v1782_v49  ;;  %v1781_v52 = vmul.f32 %v3200_v50, %v3196_v33 }
0x11d7   :  { %2988 = vmatmul.mubr.msk.bf16.vlgmr.msra.gmra.mxu0 %vm250_vm2, %v1784_v51  ;;  %v1783_v54 = vmul.f32 %v3584_v31, %v1781_v52 }
0x11d8   :  { %2998 = vmatpush3.bf16.xpose.msra.mxu0 %v1890_v53  ;;  %2999 = vmatprep.mubr.msk.bf16.mxu0 %vm3382_vm1, %v3381_v9 }
0x11d9   :  { %v1785_v57 = vpack.c.bf16 %v1783_v54, %v1783_v54  ;;  %3009 = vmatprep.subr.bf16.mxu0 %v3381_v9 }
0x11db   :  { %2994 = vmatmul.mubr.msk.bf16.vlgmr.msra.gmra.mxu1 %vm250_vm2, %v1785_v57 }
0x11dc   :  { %3004 = vmatpush3.bf16.xpose.msra.mxu1 %v1940_v58  ;;  %3005 = vmatprep.mubr.msk.bf16.mxu1 %vm3382_vm1, %v3381_v9 }
0x11dd   :  { %3015 = vmatprep.subr.bf16.mxu1 %v3381_v9 }
0x11df   :  { %3000 = vmatmul.mubr.msk.bf16.vlgmr.msra.gmra.mxu0 %vm250_vm2, %v1883_v60 }
0x11e0   :  { %3011 = vmatprep.mubr.msk.bf16.mxu0 %vm3382_vm1, %v3381_v9 }
0x11e3   :  { %3006 = vmatmul.mubr.msk.bf16.vlgmr.msra.gmra.mxu1 %vm250_vm2, %v1933_v62 }
0x11e4   :  { %3017 = vmatprep.mubr.msk.bf16.mxu1 %vm3382_vm1, %v3381_v9 }
0x1297   :  { %v3889_v63 = vpop.f32.mrf.mxu0 }
0x1299   :  { %v2989_v45 = vpop.f32.mrf.mxu0 }
0x129b   :  { %v1831_v41 = vpop.f32.mrf.mxu0  ;;  %v3891_v5 = vpop.f32.mrf.mxu1 }
0x129c   :  { %v3114_v7 = vpack.i.bf16 %v3891_v5, %v3889_v63 }
0x129d   :  { %v2990_v10 = vpop.f32.mrf.mxu0  ;;  %v2995_v11 = vpop.f32.mrf.mxu1 }
0x129f   :  { %v1879_v12 = vpop.f32.mrf.mxu1  ;;  %v1926_v0 = vpop.f32.mrf.mxu0 }
0x12a0   :  { %v1982_v15 = vmul.f32 0.35355338, %v1926_v0 }
0x12a1   :  { %v2996_v1 = vpop.f32.mrf.mxu1  ;;  %v3001_v46 = vpop.f32.mrf.mxu0 }
0x12a2   :  { %v1984_v38 = vadd.f32 %v1982_v15, %v3547_v55 }
0x12a3   :  { %v1929_v43 = vpop.f32.mrf.mxu0  ;;  %v1976_v44 = vpop.f32.mrf.mxu1 }
0x12a4   :  { %v1983_v16 = vmul.f32 0.35355338, %v1976_v44  ;;  %v1986_v17 = vsel %vm250_vm2, %v1984_v38, -inf }
0x12a5   :  { %1987 = vmax.xlane.f32.xlu1 %v1986_v17  ;;  %v3002_v18 = vpop.f32.mrf.mxu0  ;;  %v3007_v19 = vpop.f32.mrf.mxu1 }
0x12a6   :  { %v1985_v20 = vadd.f32 %v1983_v16, %v3553_v61 }
0x12a7   :  { %v1979_v21 = vpop.f32.mrf.mxu1 }
0x12a8   :  { %v1989_v22 = vsel %vm250_vm2, %v1985_v20, -inf }
0x12a9   :  { %1990 = vmax.xlane.f32.xlu0 %v1989_v22  ;;  %v3008_v23 = vpop.f32.mrf.mxu1 }
0x12b6   :  { %2012 = vrot.lane.b32.xlu1 %v3780_v59, %s3388_s12 }
0x12ba   :  { %2110 = vrot.lane.b32.xlu1 %v3780_v59, %s3392_s15 }
0x12be   :  { %2160 = vrot.lane.b32.xlu1 %v3784_v3, %s3392_s15 }
0x12c2   :  { %2108 = vrot.lane.b32.xlu1 %v3793_v8, %s3392_s15 }
0x132e   :  { %v1988_v24 = vpop.xlane.xlu1 %1987 }
0x132f   :  { %v1992_v25 = vsub.f32 %v1984_v38, %v1988_v24 }
0x1331   :  { %v1994_v26 = vmul.f32 1.442695, %v1992_v25 }
0x1332   :  { %v2013_v42 = vpop.permute.xlu1 %2012  ;;  %v1991_v28 = vpop.xlane.xlu0 %1990 }
0x1333   :  { %3201 = vpow2.f32 %v1994_v26  ;;  %v2018_v29 = vsel %vm381_vm5, %v2013_v42, 0  ;;  %v1993_v30 = vsub.f32 %v1985_v20, %v1991_v28 }
0x1334   :  { %3010 = vmatpush3.bf16.msra.mxu0 %v2018_v29 }
0x1335   :  { %v1996_v32 = vmul.f32 1.442695, %v1993_v30  ;;  %3021 = vmatprep.subr.bf16.mxu0 %v3381_v9 }
0x1336   :  { %v2111_v49 = vpop.permute.xlu1 %2110 }
0x1337   :  { %3203 = vpow2.f32 %v1996_v32 }
0x133a   :  { %v2161_v56 = vpop.permute.xlu1 %2160 }
0x133b   :  { %v2166_v58 = vsel %vm250_vm2, %v2161_v56, 0 }
0x133e   :  { %v2109_v60 = vpop.permute.xlu1 %2108 }
0x1340   :  { %v3202_v33 = vpop.eup %3201 }
0x1341   :  { %v1998_v34 = vsel %vm250_vm2, %v3202_v33, 0.0 }
0x1342   :  { %1999 = vadd.xlane.f32.xlu0 %v1998_v34 }
0x1344   :  { %v3204_v35 = vpop.eup %3203 }
0x1345   :  { %v2001_v8 = vsel %vm250_vm2, %v3204_v35, 0.0 }
0x1346   :  { %2002 = vadd.xlane.f32.xlu0 %v2001_v8 }
0x135c   :  { %2060 = vrot.lane.b32.xlu0 %v3784_v3, %s3388_s12 }
0x1360   :  { %2158 = vrot.lane.b32.xlu0 %v3799_v14, %s3392_s15  ;;  %v2116_v14 = vsel %vm250_vm2, %v2111_v49, 0 }
0x13cb   :  { %v2000_v36 = vpop.xlane.xlu0 %1999 }
0x13cc   :  { %3205 = vrcp.f32 %v2000_v36 }
0x13cf   :  { %v2003_v37 = vpop.xlane.xlu0 %2002 }
0x13d0   :  { %3207 = vrcp.f32 %v2003_v37 }
0x13d3   :  { %v2061_v39 = vpop.permute.xlu0 %2060 }
0x13d4   :  { %v2066_v40 = vsel %vm381_vm5, %v2061_v39, 0 }
0x13d5   :  { %3016 = vmatpush3.bf16.msra.mxu1 %v2066_v40 }
0x13d6   :  { %3027 = vmatprep.subr.bf16.mxu1 %v3381_v9 }
0x13d7   :  { %v2159_v62 = vpop.permute.xlu0 %2158 }
0x13d9   :  { %v3206_v47 = vpop.eup %3205 }
0x13da   :  { %v2006_v48 = vmul.f32 %v3206_v47, %v3202_v33 }
0x13dc   :  { %v2008_v50 = vmul.f32 %v3578_v27, %v2006_v48 }
0x13dd   :  { %v3208_v51 = vpop.eup %3207 }
0x13de   :  { %v2010_v52 = vpack.c.bf16 %v2008_v50, %v2008_v50  ;;  %v2007_v53 = vmul.f32 %v3208_v51, %v3204_v35 }
0x13e0   :  { %3012 = vmatmul.mubr.msk.bf16.vlgmr.msra.gmra.mxu0 %vm250_vm2, %v2010_v52  ;;  %v2009_v54 = vmul.f32 %v3584_v31, %v2007_v53 }
0x13e1   :  { %3022 = vmatpush3.bf16.xpose.msra.mxu0 %v2116_v14  ;;  %3023 = vmatprep.mubr.msk.bf16.mxu0 %vm3382_vm1, %v3381_v9 }
0x13e2   :  { %v2011_v57 = vpack.c.bf16 %v2009_v54, %v2009_v54  ;;  %3033 = vmatprep.subr.bf16.mxu0 %v3381_v9 }
0x13e4   :  { %3018 = vmatmul.mubr.msk.bf16.vlgmr.msra.gmra.mxu1 %vm250_vm2, %v2011_v57 }
0x13e5   :  { %3028 = vmatpush3.bf16.xpose.msra.mxu1 %v2166_v58  ;;  %3029 = vmatprep.mubr.msk.bf16.mxu1 %vm3382_vm1, %v3381_v9 }
0x13e6   :  { %3039 = vmatprep.subr.bf16.mxu1 %v3381_v9 }
0x13e8   :  { %3024 = vmatmul.mubr.msk.bf16.vlgmr.msra.gmra.mxu0 %vm250_vm2, %v2109_v60 }
0x13e9   :  { %3035 = vmatprep.mubr.msk.bf16.mxu0 %vm3382_vm1, %v3381_v9 }
0x13ec   :  { %3030 = vmatmul.mubr.msk.bf16.vlgmr.msra.gmra.mxu1 %vm250_vm2, %v2159_v62 }
0x13ed   :  { %3041 = vmatprep.mubr.msk.bf16.mxu1 %vm3382_vm1, %v3381_v9 }
0x14a0   :  { %v2054_v45 = vpop.f32.mrf.mxu0 }
0x14a2   :  { %v3013_v41 = vpop.f32.mrf.mxu0 }
0x14a4   :  { %v2057_v10 = vpop.f32.mrf.mxu0  ;;  %v2102_v11 = vpop.f32.mrf.mxu1 }
0x14a6   :  { %v3014_v12 = vpop.f32.mrf.mxu0  ;;  %v3019_v0 = vpop.f32.mrf.mxu1 }
0x14a8   :  { %v2105_v15 = vpop.f32.mrf.mxu1  ;;  %v2152_v1 = vpop.f32.mrf.mxu0 }
0x14a9   :  { %v2208_v46 = vmul.f32 0.35355338, %v2152_v1 }
0x14aa   :  { %v3020_v38 = vpop.f32.mrf.mxu1  ;;  %v3025_v43 = vpop.f32.mrf.mxu0 }
0x14ab   :  { %v2210_v44 = vadd.f32 %v2208_v46, %v3547_v55  ;;  %v3119_v55 = vpack.i.bf16 %v2102_v11, %v2054_v45 }
0x14ac   :  { %v2155_v16 = vpop.f32.mrf.mxu0  ;;  %v2202_v17 = vpop.f32.mrf.mxu1 }
0x14ad   :  { %v2209_v18 = vmul.f32 0.35355338, %v2202_v17  ;;  %v2212_v19 = vsel %vm250_vm2, %v2210_v44, -inf }
0x14ae   :  { %2213 = vmax.xlane.f32.xlu1 %v2212_v19  ;;  %v3026_v20 = vpop.f32.mrf.mxu0  ;;  %v3031_v21 = vpop.f32.mrf.mxu1 }
0x14af   :  { %v2211_v22 = vadd.f32 %v2209_v18, %v3553_v61 }
0x14b0   :  { %v2205_v23 = vpop.f32.mrf.mxu1 }
0x14b1   :  { %v2215_v24 = vsel %vm250_vm2, %v2211_v22, -inf }
0x14b2   :  { %2216 = vmax.xlane.f32.xlu0 %v2215_v24  ;;  %v3032_v25 = vpop.f32.mrf.mxu1 }
0x14bf   :  { %2238 = vrot.lane.b32.xlu1 %v3780_v59, %s3391_s14 }
0x14c3   :  { %3115 = vrot.lane.b32.xlu1 %v3114_v7, %s3374_s19 }
0x14c7   :  { %3120 = vrot.lane.b32.xlu1 %v3119_v55, %s3394_s17 }
0x1537   :  { %v2214_v26 = vpop.xlane.xlu1 %2213 }
0x1538   :  { %v2218_v42 = vsub.f32 %v2210_v44, %v2214_v26 }
0x153a   :  { %v2220_v28 = vmul.f32 1.442695, %v2218_v42 }
0x153b   :  { %v2239_v61 = vpop.permute.xlu1 %2238  ;;  %v2217_v29 = vpop.xlane.xlu0 %2216 }
0x153c   :  { %3209 = vpow2.f32 %v2220_v28  ;;  %v2244_v30 = vsel %vm381_vm5, %v2239_v61, 0  ;;  %v2219_v32 = vsub.f32 %v2211_v22, %v2217_v29  ;;  %v3139_v61 = vld [vmem:[#allocation11 + $0x8] sm:$0xff]   ;;  %v3140_v29 = vld [vmem:[#allocation11] sm:$0xff]  }
0x153d   :  { %3034 = vmatpush3.bf16.msra.mxu0 %v2244_v30  ;;  %v3141_v30 = vld [vmem:[%s4049_s7 + $0x18] sm:$0xff]  }
0x153e   :  { %v2222_v33 = vmul.f32 1.442695, %v2219_v32  ;;  %3045 = vmatprep.subr.bf16.mxu0 %v3381_v9 }
0x153f   :  { %v3116_v62 = vpop.permute.xlu1 %3115 }
0x1540   :  { %3211 = vpow2.f32 %v2222_v33  ;;  %v3118_v41 = vunpack.i.h.bf16 %v3116_v62  ;;  %v3117_v10 = vunpack.i.l.bf16 %v3116_v62  ;;  %v3144_v62 = vld [vmem:[%s4049_s7] sm:$0xff]  }
0x1542   :  { %v2359_v15 = vsel %vm250_vm2, %v3847_v4, %v3118_v41  ;;  %v2358_v1 = vsel %vm250_vm2, %v3845_v2, %v3117_v10  ;;  %v2721_v2 = vld [vmem:[%s4050_s8 + $0x4] ss:$0 sm:$0xff] }
0x1543   :  { %v3121_v45 = vpop.permute.xlu1 %3120 }
0x1544   :  { %v3123_v11 = vunpack.i.h.bf16 %v3121_v45  ;;  %v3122_v12 = vunpack.i.l.bf16 %v3121_v45  ;;  %v2724_v45 = vld [vmem:[%s4050_s8 + $0x5] ss:$0 sm:$0xff] }
0x1546   :  { %v2361_v43 = vsel %vm1177_vm6, %v2359_v15, %v3123_v11  ;;  %v2360_v44 = vsel %vm1177_vm6, %v2358_v1, %v3122_v12 }
0x1549   :  { %v3210_v59 = vpop.eup %3209 }
0x154a   :  { %v2224_v63 = vsel %vm250_vm2, %v3210_v59, 0.0 }
0x154b   :  { %2225 = vadd.xlane.f32.xlu0 %v2224_v63 }
0x154d   :  { %v3212_v5 = vpop.eup %3211 }
0x154e   :  { %v2227_v7 = vsel %vm250_vm2, %v3212_v5, 0.0 }
0x154f   :  { %2228 = vadd.xlane.f32.xlu0 %v2227_v7 }
0x1565   :  { %2286 = vrot.lane.b32.xlu0 %v3784_v3, %s3391_s14 }
0x15d4   :  { %v2226_v34 = vpop.xlane.xlu0 %2225 }
0x15d5   :  { %3213 = vrcp.f32 %v2226_v34 }
0x15d8   :  { %v2229_v35 = vpop.xlane.xlu0 %2228 }
0x15d9   :  { %3215 = vrcp.f32 %v2229_v35 }
0x15dc   :  { %v2287_v8 = vpop.permute.xlu0 %2286 }
0x15dd   :  { %v2292_v36 = vsel %vm381_vm5, %v2287_v8, 0 }
0x15de   :  { %3040 = vmatpush3.bf16.msra.mxu1 %v2292_v36 }
0x15df   :  { %3053 = vmatprep.subr.bf16.mxu1 %v3381_v9 }
0x15e2   :  { %v3214_v37 = vpop.eup %3213 }
0x15e3   :  { %v2232_v39 = vmul.f32 %v3214_v37, %v3210_v59 }
0x15e5   :  { %v2234_v40 = vmul.f32 %v3578_v27, %v2232_v39  ;;  %v3137_v27 = vld [vmem:[%s4047_s5 + $0x28] sm:$0xff]  }
0x15e6   :  { %v3216_v47 = vpop.eup %3215 }
0x15e7   :  { %v2236_v48 = vpack.c.bf16 %v2234_v40, %v2234_v40  ;;  %v2233_v49 = vmul.f32 %v3216_v47, %v3212_v5 }
0x15e9   :  { %3036 = vmatmul.mubr.msk.bf16.vlgmr.msra.gmra.mxu0 %vm250_vm2, %v2236_v48  ;;  %v2235_v3 = vmul.f32 %v3584_v31, %v2233_v49  ;;  %v3138_v31 = vld [vmem:[%s4047_s5 + $0x20] sm:$0xff]  }
0x15ea   :  { %3049 = vmatprep.mubr.msk.bf16.mxu0 %vm3382_vm1, %v3381_v9  ;;  %3046 = vmatpush3.bf16.msra.mxu0 %v3137_v27 }
0x15eb   :  { %v2237_v50 = vpack.c.bf16 %v2235_v3, %v2235_v3  ;;  %3047 = vmatprep.subr.bf16.mxu0 %v3381_v9 }
0x15ed   :  { %3042 = vmatmul.mubr.msk.bf16.vlgmr.msra.gmra.mxu1 %vm250_vm2, %v2237_v50  ;;  %v2722_v50 = vld [vmem:[%s4051_s9 + $0x2] ss:$0 sm:$0xff] }
0x15ee   :  { %3057 = vmatprep.mubr.msk.bf16.mxu1 %vm3382_vm1, %v3381_v9  ;;  %3048 = vmatpush3.bf16.msra.mxu0 %v3138_v31 }
0x15ef   :  { %3061 = vmatprep.subr.bf16.mxu0 %v3381_v9  ;;  %3054 = vmatpush3.bf16.msra.mxu1 %v3139_v61 }
0x15f0   :  { %3055 = vmatprep.subr.bf16.mxu1 %v3381_v9 }
0x15f3   :  { %3056 = vmatpush3.bf16.msra.mxu1 %v3140_v29 }
0x16a9   :  { %v2280_v51 = vpop.f32.mrf.mxu0 }
0x16ab   :  { %v3037_v52 = vpop.f32.mrf.mxu0 }
0x16ad   :  { %v2283_v53 = vpop.f32.mrf.mxu0  ;;  %v2328_v14 = vpop.f32.mrf.mxu1 }
0x16ae   :  { %v3124_v54 = vpack.i.bf16 %v2328_v14, %v2280_v51  ;;  %v2723_v53 = vld [vmem:[%s4051_s9 + $0x5] ss:$0 sm:$0xff] }
0x16af   :  { %v3038_v56 = vpop.f32.mrf.mxu0  ;;  %v3043_v57 = vpop.f32.mrf.mxu1 }
0x16b0   :  { %3125 = vrot.lane.b32.xlu1 %v3124_v54, %s3395_s2 }
0x16b1   :  { %v2331_v58 = vpop.f32.mrf.mxu1 }
0x16b2   :  { %v3142_v58 = vld [vmem:[%s4049_s7 + $0x10] sm:$0xff]  }
0x16b3   :  { %v3044_v60 = vpop.f32.mrf.mxu1 }
0x16b4   :  { %v3143_v60 = vld [vmem:[%s4049_s7 + $0x8] sm:$0xff]   ;;  %s3396_s7 = smov [#allocation13]  }
0x16b5   :  { %s2641_s16 = sshll.u32 %s3396_s7, 4  ;;  %s2642_s16 = int_to_ptr.vmem [resolvable:$true] %s2641_s16 }
0x16b6   :  { %s3341_s20 = scalar_lea.vmem %s2642_s16, 256  ;;  %p3346_p3 = scmp.lt.s32.totalorder %s2642_s16, %s2642_s16 }
0x16b7   :  { %p3342_p2 = scmp.ne.s32.totalorder %s2642_s16, %s3341_s20  ;;  %p3347_p4 = scmp.lt.s32.totalorder %s3341_s20, %s3341_s20 }
0x16b9   :  { %p3348_p5 = por %p3347_p4, %p3346_p3 }
0x16bb   :  { %p3349_p6 = pnand %p3348_p5, %p3342_p2 }
0x1722   :  { %v3126_v0 = vpop.permute.xlu1 %3125 }
0x1723   :  { %v3128_v46 = vunpack.i.h.bf16 %v3126_v0  ;;  %v3127_v38 = vunpack.i.l.bf16 %v3126_v0 }
0x1725   :  { %v2363_v16 = vsel %vm1180_vm7, %v2361_v43, %v3128_v46  ;;  %v2362_v17 = vsel %vm1180_vm7, %v2360_v44, %v3127_v38  ;;  %v2733_v43 = vld [vmem:[%s4050_s8 + $0x6] ss:$0 sm:$0xff] }
0x1726   :  { %v2369_v18 = vpack.c.bf16 %v2363_v16, %v2362_v17 }
0x1728   :  { %3050 = vmatmul.mubr.msk.bf16.vlgmr.msra.gmra.mxu0 %vm135_vm0, %v2369_v18 }
0x1729   :  { %3069 = vmatprep.mubr.msk.bf16.mxu0 %vm3382_vm1, %v3381_v9  ;;  %3062 = vmatpush3.bf16.msra.mxu0 %v3141_v30 }
0x172a   :  { %3063 = vmatprep.subr.bf16.mxu0 %v3381_v9 }
0x172d   :  { %3064 = vmatpush3.bf16.msra.mxu0 %v3142_v58 }
0x172e   :  { %3065 = vmatprep.subr.bf16.mxu0 %v3381_v9 }
0x1731   :  { %3066 = vmatpush3.bf16.msra.mxu0 %v3143_v60 }
0x1732   :  { %3067 = vmatprep.subr.bf16.mxu0 %v3381_v9 }
0x1735   :  { %3068 = vmatpush3.bf16.msra.mxu0 %v3144_v62 }
0x17e8   :  { %v2419_v4 = vpop.f32.mrf.mxu0 }
0x17e9   :  { %v2426_v19 = vadd.f32 %v2419_v4, %v3738_v6 }
0x17ea   :  { %v3051_v20 = vpop.f32.mrf.mxu0 }
0x17eb   :  { %v3986_v21 = vadd.f32 %v2721_v2, %v2426_v19 }
0x17ec   :  { %v2422_v22 = vpop.f32.mrf.mxu0 }
0x17ed   :  { %v2427_v23 = vadd.f32 %v2422_v22, %v3745_v13  ;;  %v2437_v24 = vsel %vm135_vm0, %v3986_v21, 0.0  ;;  %v2445_v25 = vmul.f32 %v3986_v21, %v3986_v21 }
0x17ee   :  { %2438 = vadd.xlane.f32.xlu0 %v2437_v24  ;;  %v3052_v55 = vpop.f32.mrf.mxu0 }
0x17ef   :  { %v3993_v26 = vadd.f32 %v2721_v2, %v2427_v23  ;;  %v2447_v42 = vsel %vm135_vm0, %v2445_v25, 0.0 }
0x17f1   :  { %v2440_v6 = vsel %vm135_vm0, %v3993_v26, 0.0  ;;  %v2446_v28 = vmul.f32 %v3993_v26, %v3993_v26 }
0x17f2   :  { %2448 = vadd.xlane.f32.xlu0 %v2447_v42  ;;  %2441 = vadd.xlane.f32.xlu1 %v2440_v6 }
0x17f3   :  { %v2450_v13 = vsel %vm135_vm0, %v2446_v28, 0.0 }
0x17f6   :  { %2451 = vadd.xlane.f32.xlu0 %v2450_v13 }
0x1877   :  { %v2439_v32 = vpop.xlane.xlu0 %2438 }
0x1878   :  { %v2443_v33 = vmul.f32 0.03125, %v2439_v32 }
0x187a   :  { %v2455_v5 = vmul.f32 %v2443_v33, %v2443_v33  ;;  %v2459_v48 = vsub.f32 %v3986_v21, %v2443_v33 }
0x187b   :  { %v2449_v59 = vpop.xlane.xlu0 %2448  ;;  %v2442_v63 = vpop.xlane.xlu1 %2441 }
0x187c   :  { %v2453_v7 = vmul.f32 0.03125, %v2449_v59  ;;  %v2444_v34 = vmul.f32 0.03125, %v2442_v63 }
0x187e   :  { %v2457_v35 = vsub.f32 %v2453_v7, %v2455_v5  ;;  %v2456_v37 = vmul.f32 %v2444_v34, %v2444_v34  ;;  %v2460_v27 = vsub.f32 %v3993_v26, %v2444_v34 }
0x187f   :  { %v2452_v8 = vpop.xlane.xlu0 %2451 }
0x1880   :  { %v2461_v36 = vadd.f32 1e-12, %v2457_v35  ;;  %v2454_v39 = vmul.f32 0.03125, %v2452_v8 }
0x1882   :  { %3217 = vrsqrt.f32 %v2461_v36  ;;  %v2458_v40 = vsub.f32 %v2454_v39, %v2456_v37 }
0x1884   :  { %v2462_v47 = vadd.f32 1e-12, %v2458_v40 }
0x1886   :  { %3219 = vrsqrt.f32 %v2462_v47 }
0x188f   :  { %v3218_v49 = vpop.eup %3217 }
0x1890   :  { %v2465_v3 = vmul.f32 %v3218_v49, %v2459_v48 }
0x1892   :  { %v2471_v52 = vmul.f32 %v2722_v50, %v2465_v3 }
0x1893   :  { %v3220_v31 = vpop.eup %3219 }
0x1894   :  { %v2466_v51 = vmul.f32 %v3220_v31, %v2460_v27  ;;  %v2477_v54 = vadd.f32 %v2723_v53, %v2471_v52 }
0x1896   :  { %v2472_v14 = vmul.f32 %v2722_v50, %v2466_v51 }
0x1898   :  { %v2478_v56 = vadd.f32 %v2723_v53, %v2472_v14 }
0x189a   :  { %v2483_v57 = vpack.c.bf16 %v2478_v56, %v2477_v54 }
0x189c   :  { %3058 = vmatmul.mubr.msk.bf16.vlgmr.msra.gmra.mxu1 %vm135_vm0, %v2483_v57 }
0x195c   :  { %v2538_v41 = vpop.f32.mrf.mxu1 }
0x195d   :  { %v2539_v11 = vadd.f32 %v2724_v45, %v2538_v41 }
0x195e   :  { %v3059_v10 = vpop.f32.mrf.mxu1 }
0x195f   :  { %v2545_v1 = vmax.f32 %v2539_v11, 0.0 }
0x1960   :  { %v2541_v12 = vpop.f32.mrf.mxu1 }
0x1961   :  { %v2542_v0 = vadd.f32 %v2724_v45, %v2541_v12 }
0x1962   :  { %v3060_v15 = vpop.f32.mrf.mxu1 }
0x1963   :  { %v2546_v46 = vmax.f32 %v2542_v0, 0.0 }
0x1965   :  { %v2555_v38 = vpack.c.bf16 %v2546_v46, %v2545_v1 }
0x1967   :  { %3070 = vmatmul.mubr.msk.bf16.vlgmr.msra.gmra.mxu0 %vm2580_vm8, %v2555_v38 }
0x1a27   :  { %v2618_v9 = vpop.f32.mrf.mxu0 }
0x1a28   :  { %v2625_v44 = vadd.f32 %v2618_v9, %v3986_v21 }
0x1a29   :  { %v3071_v16 = vpop.f32.mrf.mxu0 }
0x1a2a   :  { %v2632_v17 = vadd.f32 %v2733_v43, %v2625_v44 }
0x1a2b   :  { %v2621_v18 = vpop.f32.mrf.mxu0 }
0x1a2c   :  { %2634 = vst.msk [vmem:[#allocation13] sm:$0xff] %vm135_vm0, %v2632_v17  ;;  %v2626_v4 = vadd.f32 %v2621_v18, %v3993_v26 }
0x1a2d   :  { %v3072_v2 = vpop.f32.mrf.mxu0 }
0x1a2e   :  { %v2633_v19 = vadd.f32 %v2733_v43, %v2626_v4 }
0x1a30   :  { %2635 = vst.msk [vmem:[#allocation13 + $0x8] sm:$0xff] %vm135_vm0, %v2633_v19 }
0x1a31   :  { %3352 = shalt.err (!%p3349_p6)
}
0x1a32   :  { %2647 = dma.vmem_to_hbm [thread:$0]  %s2642_s16, 256, %s4052_s10, [#allocation4], %s3373_s18, %s3373_s18, %s3374_s19  }
0x1a33   :  { %3369 = dma.done.wait [#allocation4], 256  }
0x1a34   :  { %3370 = vsyncadd [#allocation4], 4294967040 }
0x1a35   :  { %2651 = vsyncpa [#allocation3], 1 }
0x1a36   :  { %2652 = vsyncpa [#allocation6], 1 }
0x1a37   :  { %2653 = vsyncpa [#allocation9], 1 }
0x1a38   :  { %2654 = vsyncpa [#allocation12], 1 }
0x1a39   :  { %2655 = vsyncpa [#allocation4], 1 }

</bundles_post_ra>
